<compile_context>
chip_gen: v5e
topology: v5e:2x2
jax: 0.10.0
libtpu: 0.0.40
codegen_flags: <defaults>
</compile_context>

<pallas_src>
import functools

import jax
import jax.numpy as jnp
from jax import lax
from jax.experimental import pallas as pl
from jax.experimental.pallas import tpu as pltpu

KH = KW = 3          # kernel size (3x3, stride 1, padding 1)
LANE = 128           # vreg lane width


def _round_up(x, m):
    return (x + m - 1) // m * m


def conv_relu_kernel(x_ref, w_ref, b_ref, o_ref, *, wp2):
    # x_ref: (bt, Rin, Cin)       bf16, flattened zero-padded image rows
    # w_ref: (KH*KW, Cin, Cpad)   bf16, tap-major weights (t = kh*3 + kw)
    # b_ref: (1, Cpad)            f32 bias (zero in padded lanes)
    # o_ref: (bt, Rout, Cpad)     f32 output on the padded-width row grid
    bt = x_ref.shape[0]
    rout = o_ref.shape[1]

    w_taps = [w_ref[t] for t in range(KH * KW)]      # (Cin, Cpad) each
    bvec = b_ref[...]                                # (1, Cpad) f32

    for b in range(bt):                              # static, small trip count
        xb = x_ref[b]                                # (Rin, Cin) bf16
        acc = None
        for t in range(KH * KW):
            off = (t // KW) * wp2 + (t % KW)         # static row offset of tap
            d = jnp.dot(xb[off:off + rout, :], w_taps[t],
                        preferred_element_type=jnp.float32)
            acc = d if acc is None else acc + d
        o_ref[b] = jnp.maximum(acc + bvec, 0.0).astype(o_ref.dtype)


def _vmem_capacity_bytes():
    try:
        cap = getattr(pltpu.get_tpu_info(), "vmem_capacity_bytes", None)
        if cap:
            return int(cap)
    except Exception:
        pass
    return 64 * 1024 * 1024          # conservative fallback (v7x per-core VMEM)


def _step_footprint_bytes(bt, rin, rout, cin, cout_pad):
    """Per-grid-step VMEM footprint with lane/sublane padding (bf16 in, f32 out)."""
    x_blk = bt * _round_up(rin, 16) * _round_up(cin, LANE) * 2
    o_blk = bt * _round_up(rout, 8) * cout_pad * 4
    w_blk = KH * KW * _round_up(cin, 16) * cout_pad * 2
    b_blk = 8 * cout_pad * 4
    acc = _round_up(rout, 8) * cout_pad * 4           # f32 accumulator
    return 2 * (x_blk + o_blk + w_blk + b_blk) + acc  # 2x: double-buffered


def _pick_batch_tile(B, rin, rout, cin, cout_pad, budget):
    divisors = [d for d in range(1, B + 1) if B % d == 0]
    # Prefer >= 2 grid steps (v7x has 2 TensorCores; also gives DMA overlap).
    preferred = [d for d in divisors if B // d >= 2] or divisors
    for bt in sorted(preferred, reverse=True):
        if _step_footprint_bytes(bt, rin, rout, cin, cout_pad) <= budget:
            return bt
    return 1


@jax.jit
def conv_relu(x_nchw, weight, bias):
    """ReLU(Conv2d(k=3, s=1, p=1)(x)) matching the PyTorch module's forward.

    x_nchw: (B, Cin, H, W) f32; weight: (Cout, Cin, 3, 3) f32; bias: (Cout,).
    MXU operands are rounded to bf16; accumulation and epilogue are f32.
    """
    B, Cin, H, W = x_nchw.shape
    Cout = weight.shape[0]
    cout_pad = _round_up(Cout, LANE)
    wp2 = W + 2
    rp = (H + 2) * wp2            # rows of the zero-padded image
    rin = rp + 2                  # +2 zero rows so the last tap stays in-bounds
    rout = H * wp2                # output rows computed on the padded-width grid

    # NCHW -> NHWC, halo pad, flatten (hp, wp) -> rows, 2 extra zero rows, bf16.
    x_nhwc = jnp.transpose(x_nchw, (0, 2, 3, 1))
    x_pad = jnp.pad(x_nhwc, ((0, 0), (1, 1), (1, 1), (0, 0)))
    xf = jnp.pad(x_pad.reshape(B, rp, Cin), ((0, 0), (0, 2), (0, 0)))
    xf = xf.astype(jnp.bfloat16)

    # (Cout, Cin, KH, KW) -> (KH*KW, Cin, Cout_pad), tap index t = kh*3 + kw.
    w3 = jnp.transpose(weight, (2, 3, 1, 0)).reshape(KH * KW, Cin, Cout)
    w3 = jnp.pad(w3, ((0, 0), (0, 0), (0, cout_pad - Cout))).astype(jnp.bfloat16)
    b2 = jnp.pad(bias.reshape(1, Cout), ((0, 0), (0, cout_pad - Cout)))
    b2 = b2.astype(jnp.float32)

    cap = _vmem_capacity_bytes()
    bt = _pick_batch_tile(B, rin, rout, Cin, cout_pad, budget=int(0.4 * cap))
    grid = (B // bt,)
    vmem_limit = max(32 * 1024 * 1024, int(0.7 * cap))

    kernel = functools.partial(conv_relu_kernel, wp2=wp2)
    out3 = pl.pallas_call(
        kernel,
        out_shape=jax.ShapeDtypeStruct((B, rout, cout_pad), jnp.float32),
        grid_spec=pltpu.PrefetchScalarGridSpec(
            num_scalar_prefetch=0,
            grid=grid,
            in_specs=[
                pl.BlockSpec((bt, rin, Cin), lambda i: (i, 0, 0)),
                pl.BlockSpec((KH * KW, Cin, cout_pad), lambda i: (0, 0, 0)),
                pl.BlockSpec((1, cout_pad), lambda i: (0, 0)),
            ],
            out_specs=pl.BlockSpec((bt, rout, cout_pad), lambda i: (i, 0, 0)),
        ),
        compiler_params=pltpu.CompilerParams(
            dimension_semantics=("parallel",),
            vmem_limit_bytes=vmem_limit,
        ),
    )(xf, w3, b2)

    # Drop the padded-width garbage columns and Cout lane padding; back to NCHW.
    out_nhwc = out3.reshape(B, H, wp2, cout_pad)[:, :, :W, :Cout]
    return jnp.transpose(out_nhwc, (0, 3, 1, 2)).astype(x_nchw.dtype)


if __name__ == "__main__":
    key = jax.random.PRNGKey(0)
    B, Cin, Cout, H, W = 2, 4, 8, 16, 16

    kx, kw_, kb = jax.random.split(key, 3)
    x = jax.random.normal(kx, (B, Cin, H, W), dtype=jnp.float32)
    # Deterministic init mimicking Conv2d's uniform(-bound, bound), bound = 1/sqrt(fan_in).
    fan_in = Cin * KH * KW
    bound = 1.0 / jnp.sqrt(jnp.float32(fan_in))
    weight = jax.random.uniform(kw_, (Cout, Cin, KH, KW), jnp.float32, -bound, bound)
    bias = jax.random.uniform(kb, (Cout,), jnp.float32, -bound, bound)

    out = conv_relu(x, weight, bias)
    jax.block_until_ready(out)
    assert out.shape == (B, Cout, H, W)

    # Reference with the same bf16 operand rounding (tight tolerance).
    xb = x.astype(jnp.bfloat16).astype(jnp.float32)
    wb = weight.astype(jnp.bfloat16).astype(jnp.float32)
    ref_bf16 = lax.conv_general_dilated(
        xb, wb, window_strides=(1, 1), padding=((1, 1), (1, 1)),
        dimension_numbers=("NCHW", "OIHW", "NCHW"))
    ref_bf16 = jnp.maximum(ref_bf16 + bias.reshape(1, Cout, 1, 1), 0.0)
    assert jnp.allclose(out, ref_bf16, atol=1e-4, rtol=1e-4)

    # Coarse sanity check against the full-f32 PyTorch-equivalent forward.
    ref_f32 = lax.conv_general_dilated(
        x, weight, window_strides=(1, 1), padding=((1, 1), (1, 1)),
        dimension_numbers=("NCHW", "OIHW", "NCHW"))
    ref_f32 = jnp.maximum(ref_f32 + bias.reshape(1, Cout, 1, 1), 0.0)
    assert jnp.allclose(out, ref_f32, atol=1e-1, rtol=1e-1)

    print("KERNEL_OK")
</pallas_src>

<mosaic_0001>
module attributes {stable_mosaic.version = 11 : i64} {
  func.func @conv_relu_kernel(%arg0: i32, %arg1: memref<1x326x4xbf16, #tpu.memory_space<vmem>>, %arg2: memref<9x4x128xbf16, #tpu.memory_space<vmem>>, %arg3: memref<1x128xf32, #tpu.memory_space<vmem>>, %arg4: memref<1x288x128xf32, #tpu.memory_space<vmem>>) attributes {dimension_semantics = [#tpu.dimension_semantics<parallel>], iteration_bounds = array<i64: 2>, scalar_prefetch = 0 : i64, scratch_operands = 0 : i64, tpu.core_type = #tpu.core_type<tc>, window_params = [{transform_indices = @transform_0, window_bounds = array<i64: 1, 326, 4>}, {pipeline_mode = #tpu.pipeline_mode<synchronous>, transform_indices = @transform_1, window_bounds = array<i64: 9, 4, 128>}, {pipeline_mode = #tpu.pipeline_mode<synchronous>, transform_indices = @transform_2, window_bounds = array<i64: 1, 128>}, {transform_indices = @transform_3, window_bounds = array<i64: 1, 288, 128>}]} {
    %c0 = arith.constant 0 : index
    %c0_0 = arith.constant 0 : index
    %c0_1 = arith.constant 0 : index
    %0 = vector.load %arg2[%c0, %c0_0, %c0_1] : memref<9x4x128xbf16, #tpu.memory_space<vmem>>, vector<1x4x128xbf16>
    %1 = vector.shape_cast %0 : vector<1x4x128xbf16> to vector<4x128xbf16>
    %c1 = arith.constant 1 : index
    %c0_2 = arith.constant 0 : index
    %c0_3 = arith.constant 0 : index
    %2 = vector.load %arg2[%c1, %c0_2, %c0_3] : memref<9x4x128xbf16, #tpu.memory_space<vmem>>, vector<1x4x128xbf16>
    %3 = vector.shape_cast %2 : vector<1x4x128xbf16> to vector<4x128xbf16>
    %c2 = arith.constant 2 : index
    %c0_4 = arith.constant 0 : index
    %c0_5 = arith.constant 0 : index
    %4 = vector.load %arg2[%c2, %c0_4, %c0_5] : memref<9x4x128xbf16, #tpu.memory_space<vmem>>, vector<1x4x128xbf16>
    %5 = vector.shape_cast %4 : vector<1x4x128xbf16> to vector<4x128xbf16>
    %c3 = arith.constant 3 : index
    %c0_6 = arith.constant 0 : index
    %c0_7 = arith.constant 0 : index
    %6 = vector.load %arg2[%c3, %c0_6, %c0_7] : memref<9x4x128xbf16, #tpu.memory_space<vmem>>, vector<1x4x128xbf16>
    %7 = vector.shape_cast %6 : vector<1x4x128xbf16> to vector<4x128xbf16>
    %c4 = arith.constant 4 : index
    %c0_8 = arith.constant 0 : index
    %c0_9 = arith.constant 0 : index
    %8 = vector.load %arg2[%c4, %c0_8, %c0_9] : memref<9x4x128xbf16, #tpu.memory_space<vmem>>, vector<1x4x128xbf16>
    %9 = vector.shape_cast %8 : vector<1x4x128xbf16> to vector<4x128xbf16>
    %c5 = arith.constant 5 : index
    %c0_10 = arith.constant 0 : index
    %c0_11 = arith.constant 0 : index
    %10 = vector.load %arg2[%c5, %c0_10, %c0_11] : memref<9x4x128xbf16, #tpu.memory_space<vmem>>, vector<1x4x128xbf16>
    %11 = vector.shape_cast %10 : vector<1x4x128xbf16> to vector<4x128xbf16>
    %c6 = arith.constant 6 : index
    %c0_12 = arith.constant 0 : index
    %c0_13 = arith.constant 0 : index
    %12 = vector.load %arg2[%c6, %c0_12, %c0_13] : memref<9x4x128xbf16, #tpu.memory_space<vmem>>, vector<1x4x128xbf16>
    %13 = vector.shape_cast %12 : vector<1x4x128xbf16> to vector<4x128xbf16>
    %c7 = arith.constant 7 : index
    %c0_14 = arith.constant 0 : index
    %c0_15 = arith.constant 0 : index
    %14 = vector.load %arg2[%c7, %c0_14, %c0_15] : memref<9x4x128xbf16, #tpu.memory_space<vmem>>, vector<1x4x128xbf16>
    %15 = vector.shape_cast %14 : vector<1x4x128xbf16> to vector<4x128xbf16>
    %c8 = arith.constant 8 : index
    %c0_16 = arith.constant 0 : index
    %c0_17 = arith.constant 0 : index
    %16 = vector.load %arg2[%c8, %c0_16, %c0_17] : memref<9x4x128xbf16, #tpu.memory_space<vmem>>, vector<1x4x128xbf16>
    %17 = vector.shape_cast %16 : vector<1x4x128xbf16> to vector<4x128xbf16>
    %c0_18 = arith.constant 0 : index
    %c0_19 = arith.constant 0 : index
    %18 = vector.load %arg3[%c0_18, %c0_19] : memref<1x128xf32, #tpu.memory_space<vmem>>, vector<1x128xf32>
    %c0_20 = arith.constant 0 : index
    %c0_21 = arith.constant 0 : index
    %c0_22 = arith.constant 0 : index
    %19 = vector.load %arg1[%c0_20, %c0_21, %c0_22] : memref<1x326x4xbf16, #tpu.memory_space<vmem>>, vector<1x326x4xbf16>
    %20 = vector.shape_cast %19 : vector<1x326x4xbf16> to vector<326x4xbf16>
    %21 = vector.extract_strided_slice %20 {offsets = [0, 0], sizes = [288, 4], strides = [1, 1]} : vector<326x4xbf16> to vector<288x4xbf16>
    %cst = arith.constant dense<0.000000e+00> : vector<288x128xf32>
    %22 = tpu.matmul %21, %1, %cst {dimension_numbers = #tpu.dot_dimension_numbers<[1], [0], [0], [1], [0, 0, 1, 1], [], []>} : vector<288x4xbf16>, vector<4x128xbf16>, vector<288x128xf32> -> vector<288x128xf32>
    %23 = vector.extract_strided_slice %20 {offsets = [1, 0], sizes = [288, 4], strides = [1, 1]} : vector<326x4xbf16> to vector<288x4xbf16>
    %cst_23 = arith.constant dense<0.000000e+00> : vector<288x128xf32>
    %24 = tpu.matmul %23, %3, %cst_23 {dimension_numbers = #tpu.dot_dimension_numbers<[1], [0], [0], [1], [0, 0, 1, 1], [], []>} : vector<288x4xbf16>, vector<4x128xbf16>, vector<288x128xf32> -> vector<288x128xf32>
    %25 = arith.addf %22, %24 : vector<288x128xf32>
    %26 = vector.extract_strided_slice %20 {offsets = [2, 0], sizes = [288, 4], strides = [1, 1]} : vector<326x4xbf16> to vector<288x4xbf16>
    %cst_24 = arith.constant dense<0.000000e+00> : vector<288x128xf32>
    %27 = tpu.matmul %26, %5, %cst_24 {dimension_numbers = #tpu.dot_dimension_numbers<[1], [0], [0], [1], [0, 0, 1, 1], [], []>} : vector<288x4xbf16>, vector<4x128xbf16>, vector<288x128xf32> -> vector<288x128xf32>
    %28 = arith.addf %25, %27 : vector<288x128xf32>
    %29 = vector.extract_strided_slice %20 {offsets = [18, 0], sizes = [288, 4], strides = [1, 1]} : vector<326x4xbf16> to vector<288x4xbf16>
    %cst_25 = arith.constant dense<0.000000e+00> : vector<288x128xf32>
    %30 = tpu.matmul %29, %7, %cst_25 {dimension_numbers = #tpu.dot_dimension_numbers<[1], [0], [0], [1], [0, 0, 1, 1], [], []>} : vector<288x4xbf16>, vector<4x128xbf16>, vector<288x128xf32> -> vector<288x128xf32>
    %31 = arith.addf %28, %30 : vector<288x128xf32>
    %32 = vector.extract_strided_slice %20 {offsets = [19, 0], sizes = [288, 4], strides = [1, 1]} : vector<326x4xbf16> to vector<288x4xbf16>
    %cst_26 = arith.constant dense<0.000000e+00> : vector<288x128xf32>
    %33 = tpu.matmul %32, %9, %cst_26 {dimension_numbers = #tpu.dot_dimension_numbers<[1], [0], [0], [1], [0, 0, 1, 1], [], []>} : vector<288x4xbf16>, vector<4x128xbf16>, vector<288x128xf32> -> vector<288x128xf32>
    %34 = arith.addf %31, %33 : vector<288x128xf32>
    %35 = vector.extract_strided_slice %20 {offsets = [20, 0], sizes = [288, 4], strides = [1, 1]} : vector<326x4xbf16> to vector<288x4xbf16>
    %cst_27 = arith.constant dense<0.000000e+00> : vector<288x128xf32>
    %36 = tpu.matmul %35, %11, %cst_27 {dimension_numbers = #tpu.dot_dimension_numbers<[1], [0], [0], [1], [0, 0, 1, 1], [], []>} : vector<288x4xbf16>, vector<4x128xbf16>, vector<288x128xf32> -> vector<288x128xf32>
    %37 = arith.addf %34, %36 : vector<288x128xf32>
    %38 = vector.extract_strided_slice %20 {offsets = [36, 0], sizes = [288, 4], strides = [1, 1]} : vector<326x4xbf16> to vector<288x4xbf16>
    %cst_28 = arith.constant dense<0.000000e+00> : vector<288x128xf32>
    %39 = tpu.matmul %38, %13, %cst_28 {dimension_numbers = #tpu.dot_dimension_numbers<[1], [0], [0], [1], [0, 0, 1, 1], [], []>} : vector<288x4xbf16>, vector<4x128xbf16>, vector<288x128xf32> -> vector<288x128xf32>
    %40 = arith.addf %37, %39 : vector<288x128xf32>
    %41 = vector.extract_strided_slice %20 {offsets = [37, 0], sizes = [288, 4], strides = [1, 1]} : vector<326x4xbf16> to vector<288x4xbf16>
    %cst_29 = arith.constant dense<0.000000e+00> : vector<288x128xf32>
    %42 = tpu.matmul %41, %15, %cst_29 {dimension_numbers = #tpu.dot_dimension_numbers<[1], [0], [0], [1], [0, 0, 1, 1], [], []>} : vector<288x4xbf16>, vector<4x128xbf16>, vector<288x128xf32> -> vector<288x128xf32>
    %43 = arith.addf %40, %42 : vector<288x128xf32>
    %44 = vector.extract_strided_slice %20 {offsets = [38, 0], sizes = [288, 4], strides = [1, 1]} : vector<326x4xbf16> to vector<288x4xbf16>
    %cst_30 = arith.constant dense<0.000000e+00> : vector<288x128xf32>
    %45 = tpu.matmul %44, %17, %cst_30 {dimension_numbers = #tpu.dot_dimension_numbers<[1], [0], [0], [1], [0, 0, 1, 1], [], []>} : vector<288x4xbf16>, vector<4x128xbf16>, vector<288x128xf32> -> vector<288x128xf32>
    %46 = arith.addf %43, %45 : vector<288x128xf32>
    %47 = vector.broadcast %18 : vector<1x128xf32> to vector<288x128xf32>
    %48 = arith.addf %46, %47 : vector<288x128xf32>
    %cst_31 = arith.constant 0.000000e+00 : f32
    %49 = vector.broadcast %cst_31 : f32 to vector<288x128xf32>
    %50 = arith.maximumf %48, %49 : vector<288x128xf32>
    %c0_32 = arith.constant 0 : index
    %c0_33 = arith.constant 0 : index
    %c0_34 = arith.constant 0 : index
    %51 = vector.load %arg4[%c0_32, %c0_33, %c0_34] : memref<1x288x128xf32, #tpu.memory_space<vmem>>, vector<1x288x128xf32>
    %52 = vector.shape_cast %51 : vector<1x288x128xf32> to vector<288x128xf32>
    %53 = vector.shape_cast %50 : vector<288x128xf32> to vector<1x288x128xf32>
    tpu.vector_store %arg4[%c0_32, %c0_33, %c0_34], %53 {strides = array<i32>} : memref<1x288x128xf32, #tpu.memory_space<vmem>>, vector<1x288x128xf32>,
    return
  }
  func.func @transform_0(%arg0: i32) -> (i32, i32, i32) {
    %c0_i32 = arith.constant 0 : i32
    %c0_i32_0 = arith.constant 0 : i32
    %c0_i32_1 = arith.constant 0 : i32
    return %arg0, %c0_i32, %c0_i32_0 : i32, i32, i32
  }
  func.func @transform_1(%arg0: i32) -> (i32, i32, i32) {
    %c0_i32 = arith.constant 0 : i32
    %c0_i32_0 = arith.constant 0 : i32
    %c0_i32_1 = arith.constant 0 : i32
    %c0_i32_2 = arith.constant 0 : i32
    return %c0_i32, %c0_i32_0, %c0_i32_1 : i32, i32, i32
  }
  func.func @transform_2(%arg0: i32) -> (i32, i32) {
    %c0_i32 = arith.constant 0 : i32
    %c0_i32_0 = arith.constant 0 : i32
    %c0_i32_1 = arith.constant 0 : i32
    return %c0_i32, %c0_i32_0 : i32, i32
  }
  func.func @transform_3(%arg0: i32) -> (i32, i32, i32) {
    %c0_i32 = arith.constant 0 : i32
    %c0_i32_0 = arith.constant 0 : i32
    %c0_i32_1 = arith.constant 0 : i32
    return %arg0, %c0_i32, %c0_i32_0 : i32, i32, i32
  }
}

</mosaic_0001>

<bundles_post_ra>
// kernel: conv_relu.1
= control target key start
LH: loop header
LB: loop body
LE: loop exit
PB: predicated region body
PF: predicated region fallthrough
CT: control target
= control target key end

     0   :  { %s2827_s12 = smov 0   ;;  %s3871_s0 = inlined_call_operand.vmem [shape: bf16[2,326,4], index: 0, kind: input, shape index: {}]   ;;  %s3872_s1 = inlined_call_operand.vmem [shape: bf16[9,4,128], index: 1, kind: input, shape index: {}]   ;;  %s3873_s2 = inlined_call_operand.vmem [shape: f32[1,128], index: 2, kind: input, shape index: {}]   ;;  %s3874_s3 = inlined_call_operand.vmem [shape: f32[2,288,128], index: 3, kind: output, shape index: {}]  }
   0x1 LB: > { %s2489_s13 = sadd.s32 4294967295, %s2805_s12   ;;  %p2493_p0 = scmp.ge.s32.totalorder %s2805_s12, 1  ;;  %s2805_s12 = sphi %s2827_s12, %s13_s12  }
   0x2   : > { %p137_p1 = scmp.lt.s32.totalorder %s2805_s12, 3 }
   0x4   : > { %p138_p2 = pnand %p2493_p0, %p137_p1 }
   0x6   : > { %141 = sbr.rel (%p138_p2) target bundleno = 817 (0x331), region = 32 }
   0xb   : > { %v2496_v0 = vld [vmem:[%s3872_s1 + $0x2] sm:$0x3]  ;;  %vm528_vm0 = vcmask 1041408   ;;  %p161_p3 = scmp.lt.s32.totalorder %s2489_s13, 1  ;;  %v2497_v2 = vld [vmem:[%s3872_s1 + $0x4] sm:$0x3] }
   0xc   : > { %v530_v1 = vsel %vm528_vm0, %v2496_v0, 0  ;;  %v172_v3 = vld [vmem:[%s3872_s1] sm:$0x3]  ;;  %v862_v4 = vsel %vm528_vm0, %v2497_v2, 0  ;;  %v2499_v6 = vld [vmem:[%s3872_s1 + $0x8] sm:$0x3] }
   0xd   : > { %2768 = vmatpush.bf16.msra.mxu1 %v530_v1  ;;  %2769 = vmatpush.bf16.msra.mxu2 %v530_v1  ;;  %s4012_s13 = smov (!%p161_p3, %s2489_s13), 1  ;;  %v668_v5 = vsel %vm528_vm0, %v172_v3, 0  ;;  %v1294_v7 = vsel %vm528_vm0, %v2499_v6, 0  ;;  %vm324_vm1 = vsmask.f32 7424  ;;  %vm473_vm2 = vcmask 31744  }
   0xe   : > { %539 = vmatpush.bf16.msra.mxu0 %v530_v1  ;;  %s2771_s22 = smul.u32 164, %s4012_s13  ;;  %2770 = vmatpush.bf16.msra.mxu3 %v530_v1  ;;  %v2498_v45 = vld [vmem:[%s3872_s1 + $0x6] sm:$0x3]  ;;  %vm769_vm3 = vcmask 1046528   ;;  %vm1153_vm4 = vsmask.f32 6400 }
   0xf   : > { %v1016_v53 = vsel %vm528_vm0, %v2498_v45, 0  ;;  %vm1815_vm5 = vsmask.f32 5376  ;;  %vm1431_vm6 = vcmask 1045504   ;;  %vm2093_vm7 = vcmask 1044480   ;;  %s2772_s11 = smul.u32 288, %s4012_s13 }
  0x10   : > { %s2857_s25 = scalar_lea.vmem %s3871_s0, %s2771_s22 }
  0x11   : > { %871 = vmatpush.bf16.msrb.mxu2 %v862_v4  ;;  %677 = vmatpush.bf16.msrb.mxu1 %v668_v5  ;;  %v2860_v8 = vld [vmem:[%s2857_s25 + $0x28] sm:$0xff]  ;;  %v2863_v9 = vld [vmem:[%s2857_s25 + $0x30] sm:$0xff]  ;;  %v2869_v11 = vld [vmem:[%s2857_s25 + $0x58] sm:$0xff]  ;;  %s3654_s16 = scalar_lea.vmem %s3874_s3, %s2772_s11 }
  0x12   : > { %1303 = vmatpush.bf16.msrb.mxu0 %v1294_v7  ;;  %v2866_v10 = vld [vmem:[%s2857_s25 + $0x50] sm:$0xff]  ;;  %v2872_v12 = vld [vmem:[%s2857_s25] sm:$0xff]  ;;  %v2875_v13 = vld [vmem:[%s2857_s25 + $0x8] sm:$0xff]  ;;  %v2878_v14 = vshll.u32 %v2860_v8, 16  ;;  %v2881_v15 = vshrl.u32 %v2860_v8, 16  ;;  %v2884_v16 = vshll.u32 %v2863_v9, 16  ;;  %1025 = vmatpush.bf16.msrb.mxu3 %v1016_v53 }
  0x13   : > { %v2887_v17 = vshll.u32 %v2866_v10, 16  ;;  %v2890_v18 = vshrl.u32 %v2866_v10, 16  ;;  %v2893_v19 = vshll.u32 %v2869_v11, 16  ;;  %v326_v20 = vshrl.u32 %v2872_v12, 16  ;;  %v2911_v31 = vld [vmem:[%s2857_s25 + $0x78] sm:$0xff]  ;;  %v2914_v32 = vld [vmem:[%s2857_s25 + $0x80] sm:$0xff] }
  0x14   : > { %3906 = vst [vmem:[#allocation2_spill] sm:$0xff] %v2878_v14  ;;  %v328_v21 = vshll.u32 %v2872_v12, 16  ;;  %v367_v22 = vrot.slane %v2878_v14, 1  ;;  %v375_v23 = vrot.slane %v2884_v16, 1  ;;  %v3875_v25 = vshll.u32 %v2875_v13, 16  ;;  %v2922_v37 = vld [vmem:[%s2857_s25 + $0x38] sm:$0xff] }
  0x15   : > { %3907 = vst [vmem:[#allocation3_spill] sm:$0xff] %v2881_v15  ;;  %v407_v24 = vrot.slane %v2887_v17, 1  ;;  %v415_v26 = vrot.slane %v2893_v19, 1  ;;  %v2926_v38 = vld [vmem:[%s2857_s25 + $0x60] sm:$0xff]  ;;  %v2929_v39 = vshll.u32 %v2911_v31, 16  ;;  %v2932_v40 = vshrl.u32 %v2911_v31, 16 }
  0x16   : > { %3908 = vst [vmem:[#allocation4_spill] sm:$0xff] %v2884_v16  ;;  %v330_v27 = vrot.slane %v328_v21, 1  ;;  %v371_v28 = vor.u32 %v2881_v15, %v367_v22  ;;  %v335_v30 = vrot.slane %v3875_v25, 1  ;;  %v2935_v41 = vshll.u32 %v2914_v32, 16  ;;  %v2938_v42 = vld [vmem:[%s2857_s25 + $0x10] sm:$0xff]  ;;  %v2972_v59 = vld [vmem:[%s2857_s25 + $0x88] sm:$0xff] }
  0x17   : > { %3909 = vst [vmem:[#allocation5_spill] sm:$0xff] %v2887_v17  ;;  %v411_v29 = vor.u32 %v2890_v18, %v407_v24  ;;  %v3877_v43 = vrot.slane %v2929_v39, 1  ;;  %v2946_v46 = vshrl.u32 %v2863_v9, 16  ;;  %v2949_v47 = vshll.u32 %v2922_v37, 16  ;;  %v2975_v60 = vld [vmem:[%s2857_s25 + $0x48] sm:$0xff]  ;;  %v2995_v5 = vld [vmem:[%s2857_s25 + $0x40] sm:$0xff] }
  0x18   : > { %3910 = vst [vmem:[#allocation6_spill] sm:$0xff] %v2890_v18  ;;  %v331_v33 = vor.u32 %v330_v27, %v326_v20  ;;  %v376_v34 = vsel %vm324_vm1, %v371_v28, %v375_v23  ;;  %v455_v44 = vrot.slane %v2935_v41, 1  ;;  %v2952_v48 = vshrl.u32 %v2869_v11, 16  ;;  %v2998_v6 = vld [vmem:[%s2857_s25 + $0x68] sm:$0xff]  ;;  %v3011_v27 = vld [vmem:[%s2857_s25 + $0x90] sm:$0xff]  }
  0x19   : > { %v416_v35 = vsel %vm324_vm1, %v411_v29, %v415_v26  ;;  %2581 = vmatmul.msk.bf16.vlgmr.msra.gmra.mxu1 %vm473_vm2, %v376_v34  ;;  %3911 = vst [vmem:[#allocation7_spill] sm:$0xff] %v2946_v46  ;;  %v2955_v49 = vshll.u32 %v2926_v38, 16  ;;  %v451_v50 = vor.u32 %v2932_v40, %v3877_v43  ;;  %v3876_v51 = vshrl.u32 %v2875_v13, 16 }
  0x1a   : > { %2586 = vmatmul.msk.bf16.vlgmr.msra.gmra.mxu2 %vm473_vm2, %v416_v35  ;;  %v336_v36 = vsel %vm324_vm1, %v331_v33, %v335_v30  ;;  %3912 = vst [vmem:[#allocation8_spill] sm:$0xff] %v2949_v47  ;;  %v2962_v52 = vshll.u32 %v2938_v42, 16  ;;  %v379_v55 = vor.u32 %v2946_v46, %v375_v23  ;;  %v383_v56 = vrot.slane %v2949_v47, 1 }
  0x1b   : > { %2576 = vmatmul.msk.bf16.vlgmr.msra.gmra.mxu0 %vm473_vm2, %v336_v36  ;;  %v456_v54 = vsel %vm324_vm1, %v451_v50, %v455_v44  ;;  %v419_v57 = vor.u32 %v2952_v48, %v415_v26  ;;  %v423_v58 = vrot.slane %v2955_v49, 1  ;;  %v339_v61 = vor.u32 %v3876_v51, %v335_v30  ;;  %v3008_v26 = vld [vmem:[%s2857_s25 + $0x18] sm:$0xff]  ;;  %3917 = vst [vmem:[#allocation13_spill] sm:$0xff] %v3011_v27  ;;  %v3028_v36 = vld [vmem:[%s2857_s25 + $0x20] sm:$0xff] }
  0x1c   : > { %2591 = vmatmul.msk.bf16.vlgmr.msra.gmra.mxu3 %vm473_vm2, %v456_v54  ;;  %v343_v62 = vrot.slane %v2962_v52, 1  ;;  %v384_v63 = vsel %vm324_vm1, %v379_v55, %v383_v56  ;;  %v2983_v1 = vshrl.u32 %v2914_v32, 16  ;;  %v2986_v2 = vshll.u32 %v2972_v59, 16  ;;  %3916 = vst [vmem:[#allocation12_spill] sm:$0xff] %v3008_v26 }
  0x1d   : > { %v424_v0 = vsel %vm324_vm1, %v419_v57, %v423_v58  ;;  %v2989_v3 = vshll.u32 %v2975_v60, 16  ;;  %v3005_v23 = vshrl.u32 %v2975_v60, 16  ;;  %v3015_v29 = vshrl.u32 %v2922_v37, 16  ;;  %3920 = vst [vmem:[#allocation16_spill] sm:$0xff] %v3028_v36 }
  0x1e   : > { %3913 = vst [vmem:[#allocation9_spill] sm:$0xff] %v2986_v2  ;;  %v344_v4 = vsel %vm324_vm1, %v339_v61, %v343_v62  ;;  %v459_v7 = vor.u32 %v2983_v1, %v455_v44  ;;  %v463_v20 = vrot.slane %v2986_v2, 1  ;;  %v3018_v30 = vshll.u32 %v2995_v5, 16 }
  0x1f   : > { %3914 = vst [vmem:[#allocation10_spill] sm:$0xff] %v2989_v3  ;;  %v399_v21 = vrot.slane %v2989_v3, 1  ;;  %v3021_v33 = vshrl.u32 %v2926_v38, 16  ;;  %v3024_v34 = vshll.u32 %v2998_v6, 16  ;;  %v2760_v44 = vunpack.c.l.b16 %v3011_v27 }
  0x20   : > { %3915 = vst [vmem:[#allocation11_spill] sm:$0xff] %v3005_v23  ;;  %v464_v35 = vsel %vm324_vm1, %v459_v7, %v463_v20  ;;  %v3037_v50 = vshrl.u32 %v2938_v42, 16  ;;  %v3040_v53 = vshll.u32 %v3008_v26, 16  ;;  %v387_v54 = vor.u32 %v3015_v29, %v383_v56 }
  0x21   : > { %v403_v28 = vor.u32 %v3005_v23, %v399_v21  ;;  %3918 = vst [vmem:[#allocation14_spill] sm:$0xff] %v3015_v29  ;;  %v391_v55 = vrot.slane %v3018_v30, 1  ;;  %v427_v57 = vor.u32 %v3021_v33, %v423_v58  ;;  %v431_v61 = vrot.slane %v3024_v34, 1 }
  0x22   : > { %3919 = vst [vmem:[#allocation15_spill] sm:$0xff] %v3018_v30  ;;  %v3062_v25 = vshrl.u32 %v3028_v36, 16 }
  0x23   : > { %v3034_v45 = vsel %vm324_vm1, %v403_v28, %v407_v24  ;;  %3921 = vst [vmem:[#allocation17_spill] sm:$0xff] %v3040_v53  ;;  %v3048_v24 = vshll.u32 %v3028_v36, 16  ;;  %v392_v56 = vsel %vm324_vm1, %v387_v54, %v391_v55  ;;  %v432_v7 = vsel %vm324_vm1, %v427_v57, %v431_v61  ;;  %v3070_v54 = vld [vmem:[%s2857_s25 + $0x70] sm:$0xff] }
  0x24   : > { %v3058_v28 = vshrl.u32 %v2972_v59, 16  ;;  %3925 = vst [vmem:[#allocation21_spill] sm:$0xff] %v3062_v25 }
  0x25   : > { %3922 = vst [vmem:[#allocation18_spill] sm:$0xff] %v3048_v24  ;;  %v359_v58 = vrot.slane %v3048_v24, 1 }
  0x26   : > { %3924 = vst [vmem:[#allocation20_spill] sm:$0xff] %v3058_v28  ;;  %v467_v57 = vor.u32 %v3058_v28, %v463_v20 }
  0x29   : > { %2582 = vmatmul.msk.bf16.gmra.mxu1 %vm473_vm2, %v384_v63  ;;  %v3050_v63 = vpack.c.b16 %v2760_v44, %v2760_v44 }
  0x2a   : > { %2587 = vmatmul.msk.bf16.gmra.mxu2 %vm473_vm2, %v424_v0  ;;  %v347_v0 = vor.u32 %v3037_v50, %v343_v62  ;;  %v363_v62 = vor.u32 %v3062_v25, %v359_v58 }
  0x2b   : > { %2577 = vmatmul.msk.bf16.gmra.mxu0 %vm473_vm2, %v344_v4  ;;  %3923 = vst [vmem:[#allocation19_spill] sm:$0xff] %v3050_v63  ;;  %v351_v4 = vrot.slane %v3040_v53, 1 }
  0x2c   : > { %2592 = vmatmul.msk.bf16.gmra.mxu3 %vm473_vm2, %v464_v35  ;;  %v469_v35 = vshll.u32 %v3050_v63, 16  ;;  %v368_v43 = vsel %vm324_vm1, %v363_v62, %v367_v22  ;;  %v3077_v63 = vshrl.u32 %v2995_v5, 16 }
  0x2d   : > { %v352_v44 = vsel %vm324_vm1, %v347_v0, %v351_v4  ;;  %v3080_v0 = vshrl.u32 %v2998_v6, 16 }
  0x2e   : > { %v471_v51 = vrot.slane %v469_v35, 1  ;;  %3926 = vst [vmem:[#allocation22_spill] sm:$0xff] %v3077_v63  ;;  %v395_v20 = vor.u32 %v3077_v63, %v391_v55  ;;  %v2501_v55 = vld [vmem:[%s3872_s1 + $0xc] sm:$0x3] }
  0x2f   : > { %v435_v22 = vor.u32 %v3080_v0, %v431_v61  ;;  %v773_v61 = vrot.slane %v2938_v42, 1 }
  0x30   : > { %v400_v2 = vsel %vm324_vm1, %v395_v20, %v399_v21  ;;  %v1678_v21 = vsel %vm528_vm0, %v2501_v55, 0 }
  0x31   : > { %1687 = vmatpush.bf16.msra.mxu2 %v1678_v21  ;;  %v775_v21 = vrot.slane %v3008_v26, 1 }
  0x39   : > { %2583 = vmatmul.msk.bf16.gmra.mxu1 %vm473_vm2, %v392_v56  ;;  %v3083_v56 = vshll.u32 %v3070_v54, 16 }
  0x3a   : > { %2588 = vmatmul.msk.bf16.gmra.mxu2 %vm473_vm2, %v432_v7  ;;  %v472_v7 = vsel %vm324_vm1, %v467_v57, %v471_v51  ;;  %v771_v51 = vrot.slane %v2875_v13, 1 }
  0x3b   : > { %2578 = vmatmul.msk.bf16.gmra.mxu0 %vm473_vm2, %v352_v44  ;;  %v3087_v44 = vshrl.u32 %v3008_v26, 16  ;;  %v439_v35 = vrot.slane %v3083_v56, 1 }
  0x3c   : > { %2593 = vmatmul.msk.bf16.gmra.mxu3 %vm473_vm2, %v472_v7  ;;  %v3119_v7 = vshrl.u32 %v3070_v54, 16  ;;  %v774_v20 = vsel %vm769_vm3, %v771_v51, %v773_v61 }
  0x3d   : > { %v355_v62 = vor.u32 %v3087_v44, %v351_v4  ;;  %v440_v28 = vsel %vm324_vm1, %v435_v22, %v439_v35  ;;  %v2502_v4 = vld [vmem:[%s3872_s1 + $0xe] sm:$0x3] }
  0x3e   : > { %v443_v22 = vor.u32 %v3119_v7, %v439_v35  ;;  %v3929_v35 = vshll.u32 %v2875_v13, 16 }
  0x3f   : > { %v360_v27 = vsel %vm324_vm1, %v355_v62, %v359_v58  ;;  %v1956_v58 = vsel %vm528_vm0, %v2502_v4, 0  ;;  %v3927_v62 = vrot.slane %v2929_v39, 1  ;;  %v776_v4 = vsel %vm769_vm3, %v773_v61, %v775_v21 }
  0x40   : > { %1965 = vmatpush.bf16.msra.mxu3 %v1956_v58 }
  0x41   : > { %v448_v55 = vsel %vm324_vm1, %v443_v22, %v3927_v62 }
  0x49   : > { %2584 = vmatmul.msk.bf16.gmra.mxu1 %vm473_vm2, %v400_v2  ;;  %v2500_v2 = vld [vmem:[%s3872_s1 + $0xa] sm:$0x3] }
  0x4a   : > { %2589 = vmatmul.msk.bf16.gmra.mxu2 %vm473_vm2, %v440_v28  ;;  %v1524_v28 = vsel %vm528_vm0, %v2500_v2, 0  ;;  %v3928_v2 = vshrl.u32 %v2875_v13, 16 }
  0x4b   : > { %2579 = vmatmul.msk.bf16.gmra.mxu0 %vm473_vm2, %v360_v27  ;;  %v2503_v27 = vld [vmem:[%s3872_s1 + $0x10] sm:$0x3]  ;;  %1533 = vmatpush.bf16.msra.mxu1 %v1524_v28  ;;  %v1155_v28 = vrot.slane %v3929_v35, 2  ;;  %v1161_v35 = vrot.slane %v3087_v44, 1 }
  0x4c   : > { %v2186_v57 = vsel %vm528_vm0, %v2503_v27, 0  ;;  %2630 = vmatmul.msk.bf16.vlgmr.msrb.gmra.mxu3 %vm473_vm2, %v774_v20  ;;  %v1154_v58 = vrot.slane %v3928_v2, 1  ;;  %v1157_v27 = vrot.slane %v3037_v50, 1 }
  0x4d   : > { %2195 = vmatpush.bf16.msra.mxu0 %v2186_v57  ;;  %v1158_v57 = vrot.slane %v2962_v52, 2 }
  0x4e   : > { %v1156_v22 = vor.u32 %v1155_v28, %v1154_v58  ;;  %v1162_v58 = vrot.slane %v3040_v53, 2 }
  0x59   : > { %2585 = vmatmul.msk.bf16.gmra.mxu1 %vm473_vm2, %v3034_v45  ;;  %v770_v45 = vrot.slane %v2872_v12, 1 }
  0x5a   : > { %2590 = vmatmul.msk.bf16.gmra.mxu2 %vm473_vm2, %v448_v55  ;;  %v777_v55 = vrot.slane %v3028_v36, 1 }
  0x5b   : > { %2580 = vmatmul.msk.bf16.gmra.mxu0 %vm473_vm2, %v368_v43  ;;  %v1159_v43 = vor.u32 %v1158_v57, %v1157_v27  ;;  %v772_v62 = vsel %vm769_vm3, %v770_v45, %v771_v51  ;;  %v1163_v51 = vor.u32 %v1162_v58, %v1161_v35  ;;  %v1165_v27 = vrot.slane %v3062_v25, 1 }
  0x5c   : > { %2631 = vmatmul.msk.bf16.gmra.mxu3 %vm473_vm2, %v776_v4  ;;  %v778_v2 = vsel %vm769_vm3, %v775_v21, %v777_v55  ;;  %v1166_v57 = vrot.slane %v3048_v24, 2 }
  0x5d   : > { %v1160_v61 = vsel %vm1153_vm4, %v1156_v22, %v1159_v43  ;;  %v1164_v28 = vsel %vm1153_vm4, %v1159_v43, %v1163_v51  ;;  %v1169_v43 = vrot.slane %v2881_v15, 1 }
  0x5e   : > { %v1167_v45 = vor.u32 %v1166_v57, %v1165_v27  ;;  %v1173_v27 = vrot.slane %v2946_v46, 1  ;;  %v1174_v57 = vrot.slane %v2884_v16, 2 }
  0x60   : > { %v1168_v22 = vsel %vm1153_vm4, %v1163_v51, %v1167_v45 }
  0x69   : > { %2594 = vmatmul.msk.bf16.vlgmr.msrb.gmra.mxu1 %vm473_vm2, %v2872_v12  ;;  %v779_v12 = vrot.slane %v2860_v8, 1 }
  0x6a   : > { %2612 = vmatmul.msk.bf16.vlgmr.msrb.gmra.mxu2 %vm473_vm2, %v772_v62  ;;  %v1170_v62 = vrot.slane %v2878_v14, 2 }
  0x6b   : > { %2648 = vmatmul.msk.bf16.vlgmr.msrb.gmra.mxu0 %vm473_vm2, %v1160_v61  ;;  %v780_v21 = vsel %vm769_vm3, %v777_v55, %v779_v12 }
  0x6c   : > { %2632 = vmatmul.msk.bf16.gmra.mxu3 %vm473_vm2, %v778_v2  ;;  %v1171_v61 = vor.u32 %v1170_v62, %v1169_v43 }
  0x79   : > { %2595 = vmatmul.msk.bf16.gmra.mxu1 %vm473_vm2, %v2875_v13  ;;  %v781_v13 = vrot.slane %v2863_v9, 1 }
  0x7a   : > { %2613 = vmatmul.msk.bf16.gmra.mxu2 %vm473_vm2, %v774_v20 }
  0x7b   : > { %2649 = vmatmul.msk.bf16.gmra.mxu0 %vm473_vm2, %v1164_v28  ;;  %v782_v20 = vsel %vm769_vm3, %v779_v12, %v781_v13 }
  0x7c   : > { %2633 = vmatmul.msk.bf16.gmra.mxu3 %vm473_vm2, %v780_v21 }
  0x89   : > { %2596 = vmatmul.msk.bf16.gmra.mxu1 %vm473_vm2, %v2938_v42  ;;  %v1172_v42 = vsel %vm1153_vm4, %v1167_v45, %v1171_v61  ;;  %v1175_v45 = vor.u32 %v1174_v57, %v1173_v27 }
  0x8a   : > { %2614 = vmatmul.msk.bf16.gmra.mxu2 %vm473_vm2, %v776_v4  ;;  %v783_v4 = vrot.slane %v2922_v37, 1 }
  0x8b   : > { %2650 = vmatmul.msk.bf16.gmra.mxu0 %vm473_vm2, %v1168_v22 }
  0x8c   : > { %2634 = vmatmul.msk.bf16.gmra.mxu3 %vm473_vm2, %v782_v20  ;;  %v784_v28 = vsel %vm769_vm3, %v781_v13, %v783_v4  ;;  %v785_v13 = vrot.slane %v2995_v5, 1 }
  0x8e   : > { %v786_v16 = vsel %vm769_vm3, %v783_v4, %v785_v13  ;;  %v787_v4 = vrot.slane %v2975_v60, 1 }
  0x96   : > { %v3172_v55 = vpop.f32.mrf.mxu1 }
  0x98   : > { %v3174_v35 = vpop.f32.mrf.mxu0 }
  0x99   : > { %2597 = vmatmul.msk.bf16.gmra.mxu1 %vm473_vm2, %v3008_v26 }
  0x9a   : > { %2615 = vmatmul.msk.bf16.gmra.mxu2 %vm473_vm2, %v778_v2 }
  0x9b   : > { %2651 = vmatmul.msk.bf16.gmra.mxu0 %vm473_vm2, %v1172_v42  ;;  %v1176_v42 = vsel %vm1153_vm4, %v1171_v61, %v1175_v45  ;;  %v1177_v61 = vrot.slane %v3015_v29, 1 }
  0x9c   : > { %2635 = vmatmul.msk.bf16.gmra.mxu3 %vm473_vm2, %v784_v28 }
  0x9d   : > { %v3182_v58 = vpop.f32.mrf.mxu2 }
  0x9e   : > { %3930 = vst [vmem:[#allocation23_spill] sm:$0xff] %v3182_v58  ;;  %v3184_v51 = vpop.f32.mrf.mxu1 }
  0x9f   : > { %v3194_v22 = vpop.f32.mrf.mxu3 }
  0xa0   : > { %v3187_v12 = vpop.f32.mrf.mxu0  ;;  %3932 = vst [vmem:[#allocation25_spill] sm:$0xff] %v3194_v22 }
  0xa5   : > { %v3192_v2 = vpop.f32.mrf.mxu2 }
  0xa6   : > { %3931 = vst [vmem:[#allocation24_spill] sm:$0xff] %v3192_v2  ;;  %v3196_v43 = vpop.f32.mrf.mxu1  ;;  %v1178_v2 = vrot.slane %v2949_v47, 2  ;;  %v788_v47 = vsel %vm769_vm3, %v785_v13, %v787_v4  ;;  %v789_v13 = vrot.slane %v2866_v10, 1 }
  0xa7   : > { %v3208_v57 = vpop.f32.mrf.mxu3 }
  0xa8   : > { %v3198_v62 = vpop.f32.mrf.mxu0  ;;  %3934 = vst [vmem:[#allocation27_spill] sm:$0xff] %v3208_v57 }
  0xa9   : > { %2598 = vmatmul.msk.bf16.gmra.mxu1 %vm473_vm2, %v3028_v36 }
  0xaa   : > { %2616 = vmatmul.msk.bf16.gmra.mxu2 %vm473_vm2, %v780_v21  ;;  %v1179_v21 = vor.u32 %v1178_v2, %v1177_v61 }
  0xab   : > { %2652 = vmatmul.msk.bf16.gmra.mxu0 %vm473_vm2, %v1176_v42 }
  0xac   : > { %2636 = vmatmul.msk.bf16.gmra.mxu3 %vm473_vm2, %v786_v16  ;;  %v1180_v58 = vsel %vm1153_vm4, %v1175_v45, %v1179_v21  ;;  %v1181_v45 = vrot.slane %v3077_v63, 1 }
  0xad   : > { %v3206_v27 = vpop.f32.mrf.mxu2 }
  0xae   : > { %3933 = vst [vmem:[#allocation26_spill] sm:$0xff] %v3206_v27  ;;  %v3210_v22 = vpop.f32.mrf.mxu1 }
  0xaf   : > { %v3220_v36 = vpop.f32.mrf.mxu3 }
  0xb0   : > { %v3213_v46 = vpop.f32.mrf.mxu0  ;;  %3936 = vst [vmem:[#allocation29_spill] sm:$0xff] %v3220_v36 }
  0xb5   : > { %v3218_v42 = vpop.f32.mrf.mxu2 }
  0xb6   : > { %3935 = vst [vmem:[#allocation28_spill] sm:$0xff] %v3218_v42  ;;  %v3222_v27 = vpop.f32.mrf.mxu1 }
  0xb7   : > { %v3234_v61 = vpop.f32.mrf.mxu3 }
  0xb8   : > { %v3224_v57 = vpop.f32.mrf.mxu0  ;;  %3938 = vst [vmem:[#allocation31_spill] sm:$0xff] %v3234_v61 }
  0xb9   : > { %2599 = vmatmul.msk.bf16.gmra.mxu1 %vm473_vm2, %v2860_v8  ;;  %v1182_v8 = vrot.slane %v3018_v30, 2  ;;  %v790_v30 = vsel %vm769_vm3, %v787_v4, %v789_v13  ;;  %v791_v4 = vrot.slane %v2869_v11, 1 }
  0xba   : > { %2617 = vmatmul.msk.bf16.gmra.mxu2 %vm473_vm2, %v782_v20 }
  0xbb   : > { %2653 = vmatmul.msk.bf16.gmra.mxu0 %vm473_vm2, %v1180_v58  ;;  %v1183_v20 = vor.u32 %v1182_v8, %v1181_v45 }
  0xbc   : > { %2637 = vmatmul.msk.bf16.gmra.mxu3 %vm473_vm2, %v788_v47 }
  0xbd   : > { %v3232_v2 = vpop.f32.mrf.mxu2  ;;  %v1184_v14 = vsel %vm1153_vm4, %v1179_v21, %v1183_v20  ;;  %v1185_v21 = vrot.slane %v3005_v23, 1  ;;  %v3287_v23 = vsel %vm769_vm3, %v789_v13, %v791_v4  ;;  %v793_v13 = vrot.slane %v2926_v38, 1 }
  0xbe   : > { %3937 = vst [vmem:[#allocation30_spill] sm:$0xff] %v3232_v2  ;;  %v3236_v36 = vpop.f32.mrf.mxu1 }
  0xbf   : > { %v3246_v42 = vpop.f32.mrf.mxu3  ;;  %v3305_v24 = vsel %vm769_vm3, %v791_v4, %v793_v13 }
  0xc0   : > { %v3239_v29 = vpop.f32.mrf.mxu0  ;;  %3940 = vst [vmem:[#allocation33_spill] sm:$0xff] %v3246_v42 }
  0xc5   : > { %v3244_v58 = vpop.f32.mrf.mxu2 }
  0xc6   : > { %3939 = vst [vmem:[#allocation32_spill] sm:$0xff] %v3244_v58  ;;  %v3248_v2 = vpop.f32.mrf.mxu1 }
  0xc7   : > { %3941 = vst [vmem:[#allocation34_spill] sm:$0xff] %v3248_v2  ;;  %v3260_v8 = vpop.f32.mrf.mxu3 }
  0xc8   : > { %v3250_v61 = vpop.f32.mrf.mxu0  ;;  %3943 = vst [vmem:[#allocation36_spill] sm:$0xff] %v3260_v8 }
  0xc9   : > { %2600 = vmatmul.msk.bf16.gmra.mxu1 %vm473_vm2, %v2863_v9  ;;  %v1186_v9 = vrot.slane %v2989_v3, 2 }
  0xca   : > { %2618 = vmatmul.msk.bf16.gmra.mxu2 %vm473_vm2, %v784_v28 }
  0xcb   : > { %2654 = vmatmul.msk.bf16.gmra.mxu0 %vm473_vm2, %v1184_v14  ;;  %v1187_v28 = vor.u32 %v1186_v9, %v1185_v21 }
  0xcc   : > { %2638 = vmatmul.msk.bf16.gmra.mxu3 %vm473_vm2, %v790_v30 }
  0xcd   : > { %v3258_v45 = vpop.f32.mrf.mxu2  ;;  %v1188_v8 = vsel %vm1153_vm4, %v1183_v20, %v1187_v28  ;;  %v1189_v20 = vrot.slane %v2890_v18, 1 }
  0xce   : > { %3942 = vst [vmem:[#allocation35_spill] sm:$0xff] %v3258_v45  ;;  %v3262_v42 = vpop.f32.mrf.mxu1 }
  0xcf   : > { %3944 = vst [vmem:[#allocation37_spill] sm:$0xff] %v3262_v42  ;;  %v1027_v58 = vpop.f32.mrf.mxu3  ;;  %v1193_v42 = vrot.slane %v2952_v48, 1 }
  0xd0   : > { %v3265_v63 = vpop.f32.mrf.mxu0 }
  0xd5   : > { %v3270_v14 = vpop.f32.mrf.mxu2 }
  0xd6   : > { %3945 = vst [vmem:[#allocation38_spill] sm:$0xff] %v3270_v14  ;;  %v3272_v15 = vpop.f32.mrf.mxu1 }
  0xd7   : > { %3946 = vst [vmem:[#allocation39_spill] sm:$0xff] %v3272_v15  ;;  %v1029_v21 = vpop.f32.mrf.mxu3 }
  0xd8   : > { %v3274_v45 = vpop.f32.mrf.mxu0 }
  0xd9   : > { %2601 = vmatmul.msk.bf16.gmra.mxu1 %vm473_vm2, %v2922_v37  ;;  %v1190_v37 = vrot.slane %v2887_v17, 2 }
  0xda   : > { %2619 = vmatmul.msk.bf16.gmra.mxu2 %vm473_vm2, %v786_v16 }
  0xdb   : > { %2655 = vmatmul.msk.bf16.gmra.mxu0 %vm473_vm2, %v1188_v8  ;;  %v1191_v16 = vor.u32 %v1190_v37, %v1189_v20 }
  0xdc   : > { %2639 = vmatmul.msk.bf16.gmra.mxu3 %vm473_vm2, %v3287_v23 }
  0xdd   : > { %v3282_v3 = vpop.f32.mrf.mxu2 }
  0xde   : > { %3947 = vst [vmem:[#allocation40_spill] sm:$0xff] %v3282_v3  ;;  %v3284_v9 = vpop.f32.mrf.mxu1 }
  0xdf   : > { %3948 = vst [vmem:[#allocation41_spill] sm:$0xff] %v3284_v9  ;;  %v1032_v26 = vpop.f32.mrf.mxu3  ;;  %v1192_v9 = vsel %vm1153_vm4, %v1187_v28, %v1191_v16 }
  0xe0   : > { %v3289_v14 = vpop.f32.mrf.mxu0 }
  0xe5   : > { %v3295_v8 = vpop.f32.mrf.mxu2 }
  0xe6   : > { %3949 = vst [vmem:[#allocation42_spill] sm:$0xff] %v3295_v8  ;;  %v679_v3 = vpop.f32.mrf.mxu1 }
  0xe7   : > { %v680_v17 = vadd.f32 %v679_v3, %v3174_v35  ;;  %v1034_v20 = vpop.f32.mrf.mxu3 }
  0xe8   : > { %v1305_v15 = vpop.f32.mrf.mxu0 }
  0xe9   : > { %2602 = vmatmul.msk.bf16.gmra.mxu1 %vm473_vm2, %v2995_v5  ;;  %v1194_v5 = vrot.slane %v2893_v19, 2 }
  0xea   : > { %2620 = vmatmul.msk.bf16.gmra.mxu2 %vm473_vm2, %v788_v47 }
  0xeb   : > { %2656 = vmatmul.msk.bf16.gmra.mxu0 %vm473_vm2, %v1192_v9  ;;  %v1195_v35 = vor.u32 %v1194_v5, %v1193_v42 }
  0xec   : > { %2640 = vmatmul.msk.bf16.gmra.mxu3 %vm473_vm2, %v3305_v24 }
  0xed   : > { %v873_v18 = vpop.f32.mrf.mxu2 }
  0xee   : > { %v963_v37 = vadd.f32 %v873_v18, %v680_v17  ;;  %v681_v8 = vpop.f32.mrf.mxu1 }
  0xef   : > { %v682_v3 = vadd.f32 %v681_v8, %v3187_v12  ;;  %v1037_v17 = vpop.f32.mrf.mxu3 }
  0xf0   : > { %v1117_v25 = vadd.f32 %v1027_v58, %v963_v37  ;;  %v1307_v28 = vpop.f32.mrf.mxu0  ;;  %v1196_v58 = vsel %vm1153_vm4, %v1191_v16, %v1195_v35 }
  0xf2   : > { %v3311_v47 = vadd.f32 %v1305_v15, %v1117_v25  ;;  %v795_v15 = vrot.slane %v2998_v6, 1 }
  0xf4   : > { %v3324_v5 = vsel %vm769_vm3, %v793_v13, %v795_v15 }
  0xf5   : > { %v875_v9 = vpop.f32.mrf.mxu2 }
  0xf6   : > { %v964_v18 = vadd.f32 %v875_v9, %v682_v3  ;;  %v684_v2 = vpop.f32.mrf.mxu1 }
  0xf7   : > { %v685_v25 = vadd.f32 %v684_v2, %v3198_v62  ;;  %v1039_v42 = vpop.f32.mrf.mxu3 }
  0xf8   : > { %v1118_v4 = vadd.f32 %v1029_v21, %v964_v18  ;;  %v1310_v53 = vpop.f32.mrf.mxu0 }
  0xf9   : > { %2603 = vmatmul.msk.bf16.gmra.mxu1 %vm473_vm2, %v2975_v60  ;;  %v1197_v60 = vrot.slane %v3021_v33, 1 }
  0xfa   : > { %2621 = vmatmul.msk.bf16.gmra.mxu2 %vm473_vm2, %v790_v30  ;;  %v3318_v37 = vadd.f32 %v1307_v28, %v1118_v4  ;;  %v1198_v30 = vrot.slane %v2955_v49, 2 }
  0xfb   : > { %2657 = vmatmul.msk.bf16.gmra.mxu0 %vm473_vm2, %v1196_v58 }
  0xfc   : > { %2641 = vmatmul.msk.bf16.gmra.mxu3 %vm473_vm2, %v3324_v5  ;;  %v1199_v2 = vor.u32 %v1198_v30, %v1197_v60  ;;  %v1201_v30 = vrot.slane %v3080_v0, 1 }
  0xfd   : > { %v878_v12 = vpop.f32.mrf.mxu2 }
  0xfe   : > { %v965_v8 = vadd.f32 %v878_v12, %v685_v25  ;;  %v686_v21 = vpop.f32.mrf.mxu1 }
  0xff   : > { %v687_v62 = vadd.f32 %v686_v21, %v3213_v46  ;;  %v1042_v18 = vpop.f32.mrf.mxu3  ;;  %v797_v46 = vrot.slane %v3070_v54, 1 }
 0x100   : > { %v1119_v16 = vadd.f32 %v1032_v26, %v965_v8  ;;  %v1312_v3 = vpop.f32.mrf.mxu0  ;;  %v1200_v26 = vsel %vm1153_vm4, %v1195_v35, %v1199_v2 }
 0x101   : > { %v3344_v35 = vsel %vm769_vm3, %v795_v15, %v797_v46 }
 0x102   : > { %v3330_v28 = vadd.f32 %v1310_v53, %v1119_v16 }
 0x105   : > { %v880_v9 = vpop.f32.mrf.mxu2 }
 0x106   : > { %v966_v4 = vadd.f32 %v880_v9, %v687_v62  ;;  %v689_v58 = vpop.f32.mrf.mxu1 }
 0x107   : > { %v690_v53 = vadd.f32 %v689_v58, %v3224_v57  ;;  %v1044_v21 = vpop.f32.mrf.mxu3 }
 0x108   : > { %v1120_v13 = vadd.f32 %v1034_v20, %v966_v4  ;;  %v1315_v25 = vpop.f32.mrf.mxu0 }
 0x109   : > { %2604 = vmatmul.msk.bf16.gmra.mxu1 %vm473_vm2, %v2866_v10 }
 0x10a   : > { %2622 = vmatmul.msk.bf16.gmra.mxu2 %vm473_vm2, %v3287_v23  ;;  %v3338_v12 = vadd.f32 %v1312_v3, %v1120_v13  ;;  %v1202_v23 = vrot.slane %v3024_v34, 2 }
 0x10b   : > { %2658 = vmatmul.msk.bf16.gmra.mxu0 %vm473_vm2, %v1200_v26 }
 0x10c   : > { %2642 = vmatmul.msk.bf16.gmra.mxu3 %vm473_vm2, %v3344_v35  ;;  %v1203_v62 = vor.u32 %v1202_v23, %v1201_v30  ;;  %v1205_v30 = vrot.slane %v3119_v7, 1 }
 0x10d   : > { %v883_v8 = vpop.f32.mrf.mxu2 }
 0x10e   : > { %v967_v20 = vadd.f32 %v883_v8, %v690_v53  ;;  %v691_v16 = vpop.f32.mrf.mxu1 }
 0x10f   : > { %v692_v57 = vadd.f32 %v691_v16, %v3239_v29  ;;  %v1047_v4 = vpop.f32.mrf.mxu3  ;;  %v799_v29 = vrot.slane %v2911_v31, 1 }
 0x110   : > { %v1121_v60 = vadd.f32 %v1037_v17, %v967_v20  ;;  %v1317_v10 = vpop.f32.mrf.mxu0  ;;  %v1204_v17 = vsel %vm1153_vm4, %v1199_v2, %v1203_v62 }
 0x111   : > { %v3364_v2 = vsel %vm769_vm3, %v797_v46, %v799_v29 }
 0x112   : > { %v3350_v3 = vadd.f32 %v1315_v25, %v1121_v60 }
 0x115   : > { %v885_v9 = vpop.f32.mrf.mxu2 }
 0x116   : > { %v968_v58 = vadd.f32 %v885_v9, %v692_v57  ;;  %v694_v13 = vpop.f32.mrf.mxu1 }
 0x117   : > { %v695_v25 = vadd.f32 %v694_v13, %v3250_v61  ;;  %v1049_v20 = vpop.f32.mrf.mxu3 }
 0x118   : > { %v1122_v15 = vadd.f32 %v1039_v42, %v968_v58  ;;  %v1320_v26 = vpop.f32.mrf.mxu0 }
 0x119   : > { %2605 = vmatmul.msk.bf16.gmra.mxu1 %vm473_vm2, %v2869_v11 }
 0x11a   : > { %2623 = vmatmul.msk.bf16.gmra.mxu2 %vm473_vm2, %v3305_v24  ;;  %v3358_v53 = vadd.f32 %v1317_v10, %v1122_v15  ;;  %v1206_v24 = vrot.slane %v3083_v56, 2 }
 0x11b   : > { %2659 = vmatmul.msk.bf16.gmra.mxu0 %vm473_vm2, %v1204_v17 }
 0x11c   : > { %2643 = vmatmul.msk.bf16.gmra.mxu3 %vm473_vm2, %v3364_v2  ;;  %v1207_v23 = vor.u32 %v1206_v24, %v1205_v30 }
 0x11d   : > { %v888_v8 = vpop.f32.mrf.mxu2 }
 0x11e   : > { %v969_v42 = vadd.f32 %v888_v8, %v695_v25  ;;  %v696_v16 = vpop.f32.mrf.mxu1 }
 0x11f   : > { %v697_v61 = vadd.f32 %v696_v16, %v3265_v63  ;;  %v1052_v9 = vpop.f32.mrf.mxu3  ;;  %v801_v63 = vrot.slane %v2914_v32, 1 }
 0x120   : > { %v1123_v60 = vadd.f32 %v1042_v18, %v969_v42  ;;  %v1322_v11 = vpop.f32.mrf.mxu0  ;;  %v1208_v18 = vsel %vm1153_vm4, %v1203_v62, %v1207_v23 }
 0x121   : > { %v3384_v62 = vsel %vm769_vm3, %v799_v29, %v801_v63 }
 0x122   : > { %v3370_v10 = vadd.f32 %v1320_v26, %v1123_v60  ;;  %v1209_v60 = vrot.slane %v2932_v40, 1 }
 0x125   : > { %v890_v57 = vpop.f32.mrf.mxu2 }
 0x126   : > { %v970_v58 = vadd.f32 %v890_v57, %v697_v61  ;;  %v699_v13 = vpop.f32.mrf.mxu1 }
 0x127   : > { %v700_v26 = vadd.f32 %v699_v13, %v3274_v45  ;;  %v1054_v8 = vpop.f32.mrf.mxu3 }
 0x128   : > { %v1124_v46 = vadd.f32 %v1044_v21, %v970_v58  ;;  %v1325_v15 = vpop.f32.mrf.mxu0 }
 0x129   : > { %2606 = vmatmul.msk.bf16.gmra.mxu1 %vm473_vm2, %v2926_v38 }
 0x12a   : > { %2624 = vmatmul.msk.bf16.gmra.mxu2 %vm473_vm2, %v3324_v5  ;;  %v3378_v17 = vadd.f32 %v1322_v11, %v1124_v46  ;;  %v1210_v5 = vrot.slane %v2929_v39, 2 }
 0x12b   : > { %2660 = vmatmul.msk.bf16.gmra.mxu0 %vm473_vm2, %v1208_v18 }
 0x12c   : > { %2644 = vmatmul.msk.bf16.gmra.mxu3 %vm473_vm2, %v3384_v62  ;;  %v1211_v30 = vor.u32 %v1210_v5, %v1209_v60 }
 0x12d   : > { %v893_v25 = vpop.f32.mrf.mxu2 }
 0x12e   : > { %v971_v21 = vadd.f32 %v893_v25, %v700_v26  ;;  %v701_v42 = vpop.f32.mrf.mxu1 }
 0x12f   : > { %v702_v45 = vadd.f32 %v701_v42, %v3289_v14  ;;  %v1057_v61 = vpop.f32.mrf.mxu3  ;;  %v3402_v14 = vrot.slane %v2972_v59, 1  ;;  %v1214_v42 = vrot.slane %v2935_v41, 2 }
 0x130   : > { %v1125_v16 = vadd.f32 %v1047_v4, %v971_v21  ;;  %v1327_v38 = vpop.f32.mrf.mxu0  ;;  %v1212_v4 = vsel %vm1153_vm4, %v1207_v23, %v1211_v30 }
 0x131   : > { %v3407_v23 = vsel %vm769_vm3, %v801_v63, %v3402_v14 }
 0x132   : > { %v3390_v11 = vadd.f32 %v1325_v15, %v1125_v16 }
 0x135   : > { %v895_v24 = vpop.f32.mrf.mxu2 }
 0x136   : > { %v972_v57 = vadd.f32 %v895_v24, %v702_v45  ;;  %v704_v58 = vpop.f32.mrf.mxu1 }
 0x137   : > { %v705_v15 = vadd.f32 %v704_v58, %v3172_v55 }
 0x138   : > { %v1126_v29 = vadd.f32 %v1049_v20, %v972_v57  ;;  %v1330_v13 = vpop.f32.mrf.mxu0  ;;  %v1059_v20 = vpop.f32.mrf.mxu3 }
 0x139   : > { %2607 = vmatmul.msk.bf16.gmra.mxu1 %vm473_vm2, %v2998_v6 }
 0x13a   : > { %2625 = vmatmul.msk.bf16.gmra.mxu2 %vm473_vm2, %v3344_v35  ;;  %v3398_v46 = vadd.f32 %v1327_v38, %v1126_v29  ;;  %v1213_v35 = vrot.slane %v2983_v1, 1 }
 0x13b   : > { %2661 = vmatmul.msk.bf16.gmra.mxu0 %vm473_vm2, %v1212_v4 }
 0x13c   : > { %2645 = vmatmul.msk.bf16.gmra.mxu3 %vm473_vm2, %v3407_v23  ;;  %v1215_v38 = vor.u32 %v1214_v42, %v1213_v35  ;;  %v2767_v35 = vld [vmem:[%s2857_s25 + $0x98] sm:$0xff]  }
 0x13d   : > { %v898_v18 = vpop.f32.mrf.mxu2 }
 0x13e   : > { %v973_v26 = vadd.f32 %v898_v18, %v705_v15  ;;  %v706_v25 = vpop.f32.mrf.mxu1 }
 0x13f   : > { %v707_v55 = vadd.f32 %v706_v25, %v3184_v51  ;;  %v3950_v51 = vld [vmem:[#allocation13_spill] sm:$0xff]  ;;  %v3951_v25 = vld [vmem:[#allocation20_spill] sm:$0xff] }
 0x140   : > { %v1127_v6 = vadd.f32 %v1052_v9, %v973_v26  ;;  %v1332_v21 = vpop.f32.mrf.mxu0  ;;  %v1062_v5 = vpop.f32.mrf.mxu3  ;;  %v1216_v9 = vsel %vm1153_vm4, %v1211_v30, %v1215_v38  ;;  %v1005_v29 = vrot.slane %v3950_v51, 1 }
 0x142   : > { %v3413_v16 = vadd.f32 %v1330_v13, %v1127_v6  ;;  %v1006_v30 = vsel %vm769_vm3, %v3402_v14, %v1005_v29  ;;  %v1217_v6 = vrot.slane %v3951_v25, 1 }
 0x145   : > { %v900_v60 = vpop.f32.mrf.mxu2 }
 0x146   : > { %v974_v45 = vadd.f32 %v900_v60, %v707_v55  ;;  %v709_v24 = vpop.f32.mrf.mxu1  ;;  %v2764_v55 = vunpack.c.l.b16 %v2767_v35 }
 0x147   : > { %v710_v13 = vadd.f32 %v709_v24, %v3196_v43 }
 0x148   : > { %v1128_v63 = vadd.f32 %v1054_v8, %v974_v45  ;;  %v1335_v57 = vpop.f32.mrf.mxu0  ;;  %v1064_v8 = vpop.f32.mrf.mxu3 }
 0x149   : > { %2608 = vmatmul.msk.bf16.gmra.mxu1 %vm473_vm2, %v3070_v54 }
 0x14a   : > { %2626 = vmatmul.msk.bf16.gmra.mxu2 %vm473_vm2, %v3364_v2  ;;  %v3421_v58 = vadd.f32 %v1332_v21, %v1128_v63  ;;  %v3952_v2 = vld [vmem:[#allocation9_spill] sm:$0xff] }
 0x14b   : > { %2662 = vmatmul.msk.bf16.gmra.mxu0 %vm473_vm2, %v1216_v9  ;;  %v1218_v21 = vrot.slane %v3952_v2, 2 }
 0x14c   : > { %2646 = vmatmul.msk.bf16.gmra.mxu3 %vm473_vm2, %v1006_v30  ;;  %v3905_v30 = vshrl.u32 %v3950_v51, 16 }
 0x14d   : > { %v903_v4 = vpop.f32.mrf.mxu2  ;;  %v1219_v60 = vor.u32 %v1218_v21, %v1217_v6 }
 0x14e   : > { %v975_v15 = vadd.f32 %v903_v4, %v710_v13  ;;  %v711_v18 = vpop.f32.mrf.mxu1  ;;  %v3435_v13 = vpack.c.b16 %v2764_v55, %v2764_v55 }
 0x14f   : > { %v712_v43 = vadd.f32 %v711_v18, %v3210_v22 }
 0x150   : > { %v1129_v26 = vadd.f32 %v1057_v61, %v975_v15  ;;  %v1337_v54 = vpop.f32.mrf.mxu0  ;;  %v1067_v24 = vpop.f32.mrf.mxu3  ;;  %v1220_v15 = vsel %vm1153_vm4, %v1215_v38, %v1219_v60  ;;  %v1007_v22 = vrot.slane %v3435_v13, 1 }
 0x152   : > { %v3432_v42 = vadd.f32 %v1335_v57, %v1129_v26 }
 0x155   : > { %v905_v45 = vpop.f32.mrf.mxu2 }
 0x156   : > { %v976_v63 = vadd.f32 %v905_v45, %v712_v43  ;;  %v714_v9 = vpop.f32.mrf.mxu1 }
 0x157   : > { %v715_v18 = vadd.f32 %v714_v9, %v3222_v27 }
 0x158   : > { %v1130_v61 = vadd.f32 %v1059_v20, %v976_v63  ;;  %v1340_v4 = vpop.f32.mrf.mxu0  ;;  %v3904_v20 = vshll.u32 %v3950_v51, 16  ;;  %v1069_v38 = vpop.f32.mrf.mxu3 }
 0x159   : > { %2609 = vmatmul.msk.bf16.gmra.mxu1 %vm473_vm2, %v2911_v31  ;;  %v1008_v31 = vsel %vm769_vm3, %v1005_v29, %v1007_v22  ;;  %v1817_v29 = vrot.slane %v2962_v52, 3  ;;  %v1819_v22 = vrot.slane %v3087_v44, 2 }
 0x15a   : > { %2627 = vmatmul.msk.bf16.gmra.mxu2 %vm473_vm2, %v3384_v62  ;;  %v3442_v57 = vadd.f32 %v1337_v54, %v1130_v61  ;;  %v1224_v54 = vrot.slane %v3905_v30, 1  ;;  %v1227_v55 = vrot.slane %v3904_v20, 2 }
 0x15b   : > { %2663 = vmatmul.msk.bf16.gmra.mxu0 %vm473_vm2, %v1220_v15 }
 0x15c   : > { %2647 = vmatmul.msk.bf16.gmra.mxu3 %vm473_vm2, %v1008_v31  ;;  %v1228_v45 = vor.u32 %v1227_v55, %v1224_v54  ;;  %v1231_v31 = vshrl.u32 %v3435_v13, 16 }
 0x15d   : > { %v908_v26 = vpop.f32.mrf.mxu2 }
 0x15e   : > { %v977_v6 = vadd.f32 %v908_v26, %v715_v18  ;;  %v716_v21 = vpop.f32.mrf.mxu1  ;;  %v3953_v18 = vld [vmem:[#allocation17_spill] sm:$0xff] }
 0x15f   : > { %v717_v43 = vadd.f32 %v716_v21, %v3236_v36  ;;  %v1820_v26 = vrot.slane %v3953_v18, 3  ;;  %v3954_v21 = vld [vmem:[#allocation34_spill] sm:$0xff] }
 0x160   : > { %v1131_v35 = vadd.f32 %v1062_v5, %v977_v6  ;;  %v1342_v62 = vpop.f32.mrf.mxu0  ;;  %v1072_v9 = vpop.f32.mrf.mxu3  ;;  %v1816_v5 = vrot.slane %v3037_v50, 2 }
 0x161   : > { %v1821_v52 = vor.u32 %v1820_v26, %v1819_v22 }
 0x162   : > { %v3455_v27 = vadd.f32 %v1340_v4, %v1131_v35  ;;  %v1229_v4 = vsel %vm1153_vm4, %v1219_v60, %v1228_v45  ;;  %v1818_v50 = vor.u32 %v1817_v29, %v1816_v5  ;;  %v3956_v29 = vld [vmem:[#allocation37_spill] sm:$0xff] }
 0x164   : > { %v1822_v55 = vsel %vm1815_vm5, %v1818_v50, %v1821_v52 }
 0x165   : > { %v910_v63 = vpop.f32.mrf.mxu2 }
 0x166   : > { %v978_v61 = vadd.f32 %v910_v63, %v717_v43  ;;  %v719_v15 = vpop.f32.mrf.mxu1  ;;  %v1233_v43 = vrot.slane %v1231_v31, 1  ;;  %v3958_v31 = vld [vmem:[#allocation18_spill] sm:$0xff] }
 0x167   : > { %v720_v44 = vadd.f32 %v719_v15, %v3954_v21  ;;  %v3955_v15 = vld [vmem:[#allocation19_spill] sm:$0xff] }
 0x168   : > { %v1132_v6 = vadd.f32 %v1064_v8, %v978_v61  ;;  %v1345_v20 = vpop.f32.mrf.mxu0  ;;  %v1234_v8 = vshll.u32 %v3435_v13, 16  ;;  %v1074_v35 = vpop.f32.mrf.mxu3  ;;  %v805_v5 = vrot.slane %v3955_v15, 1 }
 0x169   : > { %2610 = vmatmul.msk.bf16.gmra.mxu1 %vm473_vm2, %v2914_v32 }
 0x16a   : > { %2628 = vmatmul.msk.bf16.gmra.mxu2 %vm473_vm2, %v3407_v23  ;;  %v3467_v36 = vadd.f32 %v1342_v62, %v1132_v6  ;;  %v1236_v63 = vrot.slane %v1234_v8, 2  ;;  %v806_v50 = vsel %vm769_vm3, %v3402_v14, %v805_v5  ;;  %v1824_v8 = vrot.slane %v3958_v31, 3 }
 0x16b   : > { %2664 = vmatmul.msk.bf16.gmra.mxu0 %vm473_vm2, %v1229_v4 }
 0x16c   : > { %2702 = vmatmul.msk.bf16.vlgmr.msra.gmra.mxu3 %vm473_vm2, %v1822_v55  ;;  %v1237_v18 = vor.u32 %v1236_v63, %v1233_v43  ;;  %v3959_v55 = vld [vmem:[#allocation39_spill] sm:$0xff] }
 0x16d   : > { %v913_v60 = vpop.f32.mrf.mxu2 }
 0x16e   : > { %v979_v54 = vadd.f32 %v913_v60, %v720_v44  ;;  %v721_v32 = vpop.f32.mrf.mxu1 }
 0x16f   : > { %v722_v22 = vadd.f32 %v721_v32, %v3956_v29 }
 0x170   : > { %v1133_v23 = vadd.f32 %v1067_v24, %v979_v54  ;;  %v1347_v62 = vpop.f32.mrf.mxu0  ;;  %v1077_v6 = vpop.f32.mrf.mxu3  ;;  %v3957_v24 = vld [vmem:[#allocation21_spill] sm:$0xff] }
 0x171   : > { %v1823_v44 = vrot.slane %v3957_v24, 2  ;;  %v3961_v24 = vld [vmem:[#allocation41_spill] sm:$0xff] }
 0x172   : > { %v3475_v61 = vadd.f32 %v1345_v20, %v1133_v23  ;;  %v1238_v20 = vsel %vm1153_vm4, %v1228_v45, %v1237_v18  ;;  %v2783_v18 = vld [vmem:[%s2857_s25 + $0x10] sm:$0xff] }
 0x173   : > { %v1825_v14 = vor.u32 %v1824_v8, %v1823_v44  ;;  %v2094_v44 = vrot.slane %v2783_v18, 3 }
 0x175   : > { %v915_v26 = vpop.f32.mrf.mxu2  ;;  %v1826_v45 = vsel %vm1815_vm5, %v1821_v52, %v1825_v14 }
 0x176   : > { %v980_v4 = vadd.f32 %v915_v26, %v722_v22  ;;  %v724_v21 = vpop.f32.mrf.mxu1  ;;  %v2782_v22 = vld [vmem:[%s2857_s25 + $0x8] sm:$0xff]  ;;  %v1433_v26 = vrot.slane %v2783_v18, 2 }
 0x177   : > { %v725_v23 = vadd.f32 %v724_v21, %v3959_v55  ;;  %v3962_v55 = vld [vmem:[#allocation3_spill] sm:$0xff] }
 0x178   : > { %v1134_v60 = vadd.f32 %v1069_v38, %v980_v4  ;;  %v1350_v54 = vpop.f32.mrf.mxu0  ;;  %v1079_v63 = vpop.f32.mrf.mxu3  ;;  %v3960_v4 = vld [vmem:[#allocation12_spill] sm:$0xff] }
 0x179   : > { %2611 = vmatmul.msk.bf16.gmra.mxu1 %vm473_vm2, %v2972_v59  ;;  %v2095_v31 = vrot.slane %v3960_v4, 3 }
 0x17a   : > { %2629 = vmatmul.msk.bf16.gmra.mxu2 %vm473_vm2, %v806_v50  ;;  %v3487_v32 = vadd.f32 %v1347_v62, %v1134_v60  ;;  %v1432_v62 = vrot.slane %v2782_v22, 2  ;;  %v1435_v50 = vrot.slane %v3960_v4, 2 }
 0x17b   : > { %2665 = vmatmul.msk.bf16.gmra.mxu0 %vm473_vm2, %v1238_v20 }
 0x17c   : > { %2703 = vmatmul.msk.bf16.gmra.mxu3 %vm473_vm2, %v1826_v45  ;;  %v1436_v20 = vsel %vm1431_vm6, %v1433_v26, %v1435_v50 }
 0x17d   : > { %v918_v43 = vpop.f32.mrf.mxu2 }
 0x17e   : > { %v981_v38 = vadd.f32 %v918_v43, %v725_v23  ;;  %v726_v15 = vpop.f32.mrf.mxu1  ;;  %v1827_v23 = vrot.slane %v3962_v55, 2  ;;  %v3963_v43 = vld [vmem:[#allocation2_spill] sm:$0xff] }
 0x17f   : > { %v727_v21 = vadd.f32 %v726_v15, %v3961_v24  ;;  %v2096_v15 = vsel %vm2093_vm7, %v2094_v44, %v2095_v31 }
 0x180   : > { %v1135_v5 = vadd.f32 %v1072_v9, %v981_v38  ;;  %v1352_v29 = vpop.f32.mrf.mxu0  ;;  %v1082_v9 = vpop.f32.mrf.mxu3  ;;  %v1828_v38 = vrot.slane %v3963_v43, 3  ;;  %v3968_v43 = vld [vmem:[#allocation24_spill] sm:$0xff] }
 0x182   : > { %v3493_v59 = vadd.f32 %v1350_v54, %v1135_v5  ;;  %v1434_v54 = vsel %vm1431_vm6, %v1432_v62, %v1433_v26  ;;  %v1829_v18 = vor.u32 %v1828_v38, %v1827_v23  ;;  %v3965_v62 = vld [vmem:[#allocation23_spill] sm:$0xff] }
 0x185   : > { %v920_v8 = vpop.f32.mrf.mxu2 }
 0x186   : > { %v982_v52 = vadd.f32 %v920_v8, %v727_v21  ;;  %v729_v60 = vpop.f32.mrf.mxu1 }
 0x187   : > { %v730_v4 = vadd.f32 %v729_v60, %v3965_v62 }
 0x188   : > { %v1136_v45 = vadd.f32 %v1074_v35, %v982_v52  ;;  %v1355_v5 = vpop.f32.mrf.mxu0  ;;  %v1084_v24 = vpop.f32.mrf.mxu3  ;;  %v1830_v35 = vsel %vm1815_vm5, %v1825_v14, %v1829_v18 }
 0x189   : > { %2666 = vmatmul.msk.bf16.vlgmr.msra.gmra.mxu1 %vm473_vm2, %v1434_v54  ;;  %v3967_v54 = vld [vmem:[#allocation16_spill] sm:$0xff] }
 0x18a   : > { %2684 = vmatmul.msk.bf16.vlgmr.msra.gmra.mxu2 %vm473_vm2, %v1436_v20  ;;  %v3507_v22 = vadd.f32 %v1352_v29, %v1136_v45  ;;  %v1437_v29 = vrot.slane %v3967_v54, 2  ;;  %v2097_v23 = vrot.slane %v3967_v54, 3  ;;  %v3972_v54 = vld [vmem:[#allocation26_spill] sm:$0xff] }
 0x18b   : > { %2720 = vmatmul.msk.bf16.vlgmr.msra.gmra.mxu0 %vm473_vm2, %v2096_v15 }
 0x18c   : > { %3964 = vst [vmem:[#allocation13_spill] sm:$0xff] %v3507_v22  ;;  %2704 = vmatmul.msk.bf16.gmra.mxu3 %vm473_vm2, %v1830_v35 }
 0x18d   : > { %v923_v26 = vpop.f32.mrf.mxu2 }
 0x18e   : > { %v983_v21 = vadd.f32 %v923_v26, %v730_v4  ;;  %v731_v8 = vpop.f32.mrf.mxu1  ;;  %v1438_v4 = vsel %vm1431_vm6, %v1435_v50, %v1437_v29  ;;  %v3969_v26 = vld [vmem:[#allocation7_spill] sm:$0xff] }
 0x18f   : > { %v732_v45 = vadd.f32 %v731_v8, %v3968_v43  ;;  %v1831_v14 = vrot.slane %v3969_v26, 2 }
 0x190   : > { %v1137_v52 = vadd.f32 %v1077_v6, %v983_v21  ;;  %v1357_v55 = vpop.f32.mrf.mxu0  ;;  %v1087_v60 = vpop.f32.mrf.mxu3  ;;  %v3970_v6 = vld [vmem:[#allocation4_spill] sm:$0xff] }
 0x191   : > { %v1832_v21 = vrot.slane %v3970_v6, 3  ;;  %v2784_v6 = vld [vmem:[%s2857_s25 + $0x28] sm:$0xff] }
 0x192   : > { %v3513_v44 = vadd.f32 %v1355_v5, %v1137_v52  ;;  %v2098_v5 = vsel %vm2093_vm7, %v2095_v31, %v2097_v23 }
 0x193   : > { %v1833_v52 = vor.u32 %v1832_v21, %v1831_v14 }
 0x194   : > { %3966 = vst [vmem:[#allocation20_spill] sm:$0xff] %v3513_v44 }
 0x195   : > { %v925_v38 = vpop.f32.mrf.mxu2 }
 0x196   : > { %v984_v15 = vadd.f32 %v925_v38, %v732_v45  ;;  %v734_v62 = vpop.f32.mrf.mxu1 }
 0x197   : > { %v735_v50 = vadd.f32 %v734_v62, %v3972_v54 }
 0x198   : > { %v1138_v30 = vadd.f32 %v1079_v63, %v984_v15  ;;  %v1360_v35 = vpop.f32.mrf.mxu0  ;;  %v1089_v45 = vpop.f32.mrf.mxu3  ;;  %v1834_v63 = vsel %vm1815_vm5, %v1829_v18, %v1833_v52  ;;  %v3976_v18 = vld [vmem:[#allocation8_spill] sm:$0xff] }
 0x199   : > { %2667 = vmatmul.msk.bf16.gmra.mxu1 %vm473_vm2, %v1436_v20 }
 0x19a   : > { %2685 = vmatmul.msk.bf16.gmra.mxu2 %vm473_vm2, %v1438_v4  ;;  %v3524_v8 = vadd.f32 %v1357_v55, %v1138_v30  ;;  %v1439_v30 = vrot.slane %v2784_v6, 2  ;;  %v3974_v55 = vld [vmem:[#allocation28_spill] sm:$0xff] }
 0x19b   : > { %2721 = vmatmul.msk.bf16.gmra.mxu0 %vm473_vm2, %v2098_v5  ;;  %v2099_v5 = vrot.slane %v2784_v6, 3 }
 0x19c   : > { %3971 = vst [vmem:[#allocation9_spill] sm:$0xff] %v3524_v8  ;;  %2705 = vmatmul.msk.bf16.gmra.mxu3 %vm473_vm2, %v1834_v63  ;;  %v3978_v63 = vld [vmem:[#allocation30_spill] sm:$0xff] }
 0x19d   : > { %v928_v43 = vpop.f32.mrf.mxu2 }
 0x19e   : > { %v985_v38 = vadd.f32 %v928_v43, %v735_v50  ;;  %v736_v26 = vpop.f32.mrf.mxu1  ;;  %v1440_v50 = vsel %vm1431_vm6, %v1437_v29, %v1439_v30  ;;  %v3975_v43 = vld [vmem:[#allocation14_spill] sm:$0xff] }
 0x19f   : > { %v737_v8 = vadd.f32 %v736_v26, %v3974_v55  ;;  %v1835_v44 = vrot.slane %v3975_v43, 2  ;;  %v2785_v43 = vld [vmem:[%s2857_s25 + $0x30] sm:$0xff] }
 0x1a0   : > { %v1139_v15 = vadd.f32 %v1082_v9, %v985_v38  ;;  %v1362_v31 = vpop.f32.mrf.mxu0  ;;  %v1092_v21 = vpop.f32.mrf.mxu3  ;;  %v1836_v9 = vrot.slane %v3976_v18, 3  ;;  %v3980_v18 = vld [vmem:[#allocation32_spill] sm:$0xff] }
 0x1a2   : > { %v3530_v20 = vadd.f32 %v1360_v35, %v1139_v15  ;;  %v2100_v35 = vsel %vm2093_vm7, %v2097_v23, %v2099_v5 }
 0x1a4   : > { %3973 = vst [vmem:[#allocation17_spill] sm:$0xff] %v3530_v20 }
 0x1a5   : > { %v930_v14 = vpop.f32.mrf.mxu2 }
 0x1a6   : > { %v986_v62 = vadd.f32 %v930_v14, %v737_v8  ;;  %v739_v54 = vpop.f32.mrf.mxu1  ;;  %v1837_v8 = vor.u32 %v1836_v9, %v1835_v44 }
 0x1a7   : > { %v740_v29 = vadd.f32 %v739_v54, %v3978_v63 }
 0x1a8   : > { %v1140_v38 = vadd.f32 %v1084_v24, %v986_v62  ;;  %v1365_v22 = vpop.f32.mrf.mxu0  ;;  %v1094_v6 = vpop.f32.mrf.mxu3  ;;  %v1838_v24 = vsel %vm1815_vm5, %v1833_v52, %v1837_v8  ;;  %v3982_v52 = vld [vmem:[#allocation15_spill] sm:$0xff] }
 0x1a9   : > { %2668 = vmatmul.msk.bf16.gmra.mxu1 %vm473_vm2, %v1438_v4 }
 0x1aa   : > { %2686 = vmatmul.msk.bf16.gmra.mxu2 %vm473_vm2, %v1440_v50  ;;  %v3540_v26 = vadd.f32 %v1362_v31, %v1140_v38  ;;  %v1441_v31 = vrot.slane %v2785_v43, 2 }
 0x1ab   : > { %2722 = vmatmul.msk.bf16.gmra.mxu0 %vm473_vm2, %v2100_v35  ;;  %v2101_v35 = vrot.slane %v2785_v43, 3 }
 0x1ac   : > { %3977 = vst [vmem:[#allocation34_spill] sm:$0xff] %v3540_v26  ;;  %2706 = vmatmul.msk.bf16.gmra.mxu3 %vm473_vm2, %v1838_v24 }
 0x1ad   : > { %v933_v15 = vpop.f32.mrf.mxu2 }
 0x1ae   : > { %v987_v55 = vadd.f32 %v933_v15, %v740_v29  ;;  %v741_v14 = vpop.f32.mrf.mxu1  ;;  %v1442_v29 = vsel %vm1431_vm6, %v1439_v30, %v1441_v31  ;;  %v3981_v15 = vld [vmem:[#allocation22_spill] sm:$0xff] }
 0x1af   : > { %v742_v38 = vadd.f32 %v741_v14, %v3980_v18  ;;  %v1839_v26 = vrot.slane %v3981_v15, 2  ;;  %v2786_v15 = vld [vmem:[%s2857_s25 + $0x38] sm:$0xff] }
 0x1b0   : > { %v1141_v62 = vadd.f32 %v1087_v60, %v987_v55  ;;  %v1367_v23 = vpop.f32.mrf.mxu0  ;;  %v1097_v9 = vpop.f32.mrf.mxu3  ;;  %v1840_v60 = vrot.slane %v3982_v52, 3  ;;  %v3986_v52 = vld [vmem:[#allocation38_spill] sm:$0xff] }
 0x1b2   : > { %v3546_v4 = vadd.f32 %v1365_v22, %v1141_v62  ;;  %v2102_v22 = vsel %vm2093_vm7, %v2099_v5, %v2101_v35  ;;  %v1841_v24 = vor.u32 %v1840_v60, %v1839_v26  ;;  %v3984_v62 = vld [vmem:[#allocation35_spill] sm:$0xff] }
 0x1b4   : > { %3979 = vst [vmem:[#allocation19_spill] sm:$0xff] %v3546_v4 }
 0x1b5   : > { %v935_v44 = vpop.f32.mrf.mxu2 }
 0x1b6   : > { %v988_v54 = vadd.f32 %v935_v44, %v742_v38  ;;  %v744_v63 = vpop.f32.mrf.mxu1 }
 0x1b7   : > { %v745_v30 = vadd.f32 %v744_v63, %v3984_v62 }
 0x1b8   : > { %v1142_v55 = vadd.f32 %v1089_v45, %v988_v54  ;;  %v1370_v20 = vpop.f32.mrf.mxu0  ;;  %v1099_v18 = vpop.f32.mrf.mxu3  ;;  %v1842_v45 = vsel %vm1815_vm5, %v1837_v8, %v1841_v24  ;;  %v3988_v8 = vld [vmem:[#allocation10_spill] sm:$0xff] }
 0x1b9   : > { %2669 = vmatmul.msk.bf16.gmra.mxu1 %vm473_vm2, %v1440_v50 }
 0x1ba   : > { %2687 = vmatmul.msk.bf16.gmra.mxu2 %vm473_vm2, %v1442_v29  ;;  %v3556_v14 = vadd.f32 %v1367_v23, %v1142_v55  ;;  %v1443_v23 = vrot.slane %v2786_v15, 2 }
 0x1bb   : > { %2723 = vmatmul.msk.bf16.gmra.mxu0 %vm473_vm2, %v2102_v22  ;;  %v2103_v22 = vrot.slane %v2786_v15, 3 }
 0x1bc   : > { %3983 = vst [vmem:[#allocation37_spill] sm:$0xff] %v3556_v14  ;;  %2707 = vmatmul.msk.bf16.gmra.mxu3 %vm473_vm2, %v1842_v45 }
 0x1bd   : > { %v938_v43 = vpop.f32.mrf.mxu2 }
 0x1be   : > { %v989_v38 = vadd.f32 %v938_v43, %v745_v30  ;;  %v746_v44 = vpop.f32.mrf.mxu1  ;;  %v1444_v30 = vsel %vm1431_vm6, %v1441_v31, %v1443_v23  ;;  %v3987_v43 = vld [vmem:[#allocation11_spill] sm:$0xff] }
 0x1bf   : > { %v747_v55 = vadd.f32 %v746_v44, %v3986_v52  ;;  %v1843_v14 = vrot.slane %v3987_v43, 2  ;;  %v2787_v43 = vld [vmem:[%s2857_s25 + $0x40] sm:$0xff] }
 0x1c0   : > { %v1143_v54 = vadd.f32 %v1092_v21, %v989_v38  ;;  %v1372_v5 = vpop.f32.mrf.mxu0  ;;  %v1102_v60 = vpop.f32.mrf.mxu3  ;;  %v1844_v21 = vrot.slane %v3988_v8, 3  ;;  %v3991_v8 = vld [vmem:[#allocation42_spill] sm:$0xff] }
 0x1c2   : > { %v3562_v50 = vadd.f32 %v1370_v20, %v1143_v54  ;;  %v2104_v20 = vsel %vm2093_vm7, %v2101_v35, %v2103_v22  ;;  %v1845_v45 = vor.u32 %v1844_v21, %v1843_v14  ;;  %v3990_v54 = vld [vmem:[#allocation40_spill] sm:$0xff] }
 0x1c4   : > { %3985 = vst [vmem:[#allocation21_spill] sm:$0xff] %v3562_v50 }
 0x1c5   : > { %v940_v26 = vpop.f32.mrf.mxu2 }
 0x1c6   : > { %v990_v63 = vadd.f32 %v940_v26, %v747_v55  ;;  %v749_v62 = vpop.f32.mrf.mxu1 }
 0x1c7   : > { %v750_v31 = vadd.f32 %v749_v62, %v3990_v54 }
 0x1c8   : > { %v1144_v38 = vadd.f32 %v1094_v6, %v990_v63  ;;  %v1375_v4 = vpop.f32.mrf.mxu0  ;;  %v1104_v52 = vpop.f32.mrf.mxu3  ;;  %v1846_v6 = vsel %vm1815_vm5, %v1841_v24, %v1845_v45  ;;  %v3993_v24 = vld [vmem:[#allocation5_spill] sm:$0xff] }
 0x1c9   : > { %2670 = vmatmul.msk.bf16.gmra.mxu1 %vm473_vm2, %v1442_v29 }
 0x1ca   : > { %2688 = vmatmul.msk.bf16.gmra.mxu2 %vm473_vm2, %v1444_v30  ;;  %v3572_v44 = vadd.f32 %v1372_v5, %v1144_v38  ;;  %v1445_v5 = vrot.slane %v2787_v43, 2 }
 0x1cb   : > { %2724 = vmatmul.msk.bf16.gmra.mxu0 %vm473_vm2, %v2104_v20  ;;  %v2105_v20 = vrot.slane %v2787_v43, 3 }
 0x1cc   : > { %3989 = vst [vmem:[#allocation18_spill] sm:$0xff] %v3572_v44  ;;  %2708 = vmatmul.msk.bf16.gmra.mxu3 %vm473_vm2, %v1846_v6 }
 0x1cd   : > { %v943_v15 = vpop.f32.mrf.mxu2 }
 0x1ce   : > { %v991_v55 = vadd.f32 %v943_v15, %v750_v31  ;;  %v751_v26 = vpop.f32.mrf.mxu1  ;;  %v1446_v31 = vsel %vm1431_vm6, %v1443_v23, %v1445_v5  ;;  %v3992_v15 = vld [vmem:[#allocation6_spill] sm:$0xff] }
 0x1cf   : > { %v752_v38 = vadd.f32 %v751_v26, %v3991_v8  ;;  %v1847_v44 = vrot.slane %v3992_v15, 2  ;;  %v2788_v15 = vld [vmem:[%s2857_s25 + $0x48] sm:$0xff] }
 0x1d0   : > { %v1145_v63 = vadd.f32 %v1097_v9, %v991_v55  ;;  %v1377_v35 = vpop.f32.mrf.mxu0  ;;  %v1107_v21 = vpop.f32.mrf.mxu3  ;;  %v1848_v9 = vrot.slane %v3993_v24, 3  ;;  %v3995_v24 = vld [vmem:[#allocation27_spill] sm:$0xff] }
 0x1d2   : > { %v3578_v29 = vadd.f32 %v1375_v4, %v1145_v63  ;;  %v2106_v4 = vsel %vm2093_vm7, %v2103_v22, %v2105_v20  ;;  %v1849_v6 = vor.u32 %v1848_v9, %v1847_v44  ;;  %v3994_v63 = vld [vmem:[#allocation25_spill] sm:$0xff] }
 0x1d5   : > { %v945_v14 = vpop.f32.mrf.mxu2 }
 0x1d6   : > { %v992_v62 = vadd.f32 %v945_v14, %v752_v38  ;;  %v754_v54 = vpop.f32.mrf.mxu1 }
 0x1d7   : > { %v755_v23 = vadd.f32 %v754_v54, %v3994_v63 }
 0x1d8   : > { %v1146_v55 = vadd.f32 %v1099_v18, %v992_v62  ;;  %v1380_v50 = vpop.f32.mrf.mxu0  ;;  %v1109_v8 = vpop.f32.mrf.mxu3  ;;  %v1850_v18 = vsel %vm1815_vm5, %v1845_v45, %v1849_v6 }
 0x1d9   : > { %2671 = vmatmul.msk.bf16.gmra.mxu1 %vm473_vm2, %v1444_v30 }
 0x1da   : > { %2689 = vmatmul.msk.bf16.gmra.mxu2 %vm473_vm2, %v1446_v31  ;;  %v3588_v26 = vadd.f32 %v1377_v35, %v1146_v55  ;;  %v1447_v35 = vrot.slane %v2788_v15, 2 }
 0x1db   : > { %2725 = vmatmul.msk.bf16.gmra.mxu0 %vm473_vm2, %v2106_v4  ;;  %v2107_v4 = vrot.slane %v2788_v15, 3 }
 0x1dc   : > { %2709 = vmatmul.msk.bf16.gmra.mxu3 %vm473_vm2, %v1850_v18 }
 0x1dd   : > { %v948_v43 = vpop.f32.mrf.mxu2 }
 0x1de   : > { %v993_v38 = vadd.f32 %v948_v43, %v755_v23  ;;  %v756_v14 = vpop.f32.mrf.mxu1  ;;  %v1448_v23 = vsel %vm1431_vm6, %v1445_v5, %v1447_v35  ;;  %v1851_v43 = vrot.slane %v2952_v48, 2 }
 0x1df   : > { %v757_v55 = vadd.f32 %v756_v14, %v3995_v24 }
 0x1e0   : > { %v1147_v62 = vadd.f32 %v1102_v60, %v993_v38  ;;  %v1382_v22 = vpop.f32.mrf.mxu0  ;;  %v1112_v9 = vpop.f32.mrf.mxu3  ;;  %v1852_v60 = vrot.slane %v2893_v19, 3 }
 0x1e2   : > { %v3594_v30 = vadd.f32 %v1380_v50, %v1147_v62  ;;  %v2108_v50 = vsel %vm2093_vm7, %v2105_v20, %v2107_v4  ;;  %v1853_v18 = vor.u32 %v1852_v60, %v1851_v43  ;;  %v3996_v62 = vld [vmem:[#allocation29_spill] sm:$0xff] }
 0x1e5   : > { %v950_v44 = vpop.f32.mrf.mxu2 }
 0x1e6   : > { %v994_v54 = vadd.f32 %v950_v44, %v757_v55  ;;  %v759_v63 = vpop.f32.mrf.mxu1  ;;  %v2789_v44 = vld [vmem:[%s2857_s25 + $0x50] sm:$0xff] }
 0x1e7   : > { %v760_v5 = vadd.f32 %v759_v63, %v3996_v62 }
 0x1e8   : > { %v1148_v45 = vadd.f32 %v1104_v52, %v994_v54  ;;  %v1385_v38 = vpop.f32.mrf.mxu0  ;;  %v1114_v48 = vpop.f32.mrf.mxu3  ;;  %v1854_v52 = vsel %vm1815_vm5, %v1849_v6, %v1853_v18  ;;  %v3997_v54 = vld [vmem:[#allocation31_spill] sm:$0xff] }
 0x1e9   : > { %2672 = vmatmul.msk.bf16.gmra.mxu1 %vm473_vm2, %v1446_v31 }
 0x1ea   : > { %2690 = vmatmul.msk.bf16.gmra.mxu2 %vm473_vm2, %v1448_v23  ;;  %v3604_v14 = vadd.f32 %v1382_v22, %v1148_v45  ;;  %v1449_v22 = vrot.slane %v2789_v44, 2 }
 0x1eb   : > { %2726 = vmatmul.msk.bf16.gmra.mxu0 %vm473_vm2, %v2108_v50  ;;  %v2109_v50 = vrot.slane %v2789_v44, 3 }
 0x1ec   : > { %2710 = vmatmul.msk.bf16.gmra.mxu3 %vm473_vm2, %v1854_v52 }
 0x1ed   : > { %v953_v15 = vpop.f32.mrf.mxu2 }
 0x1ee   : > { %v995_v24 = vadd.f32 %v953_v15, %v760_v5  ;;  %v761_v19 = vpop.f32.mrf.mxu1  ;;  %v1450_v5 = vsel %vm1431_vm6, %v1447_v35, %v1449_v22  ;;  %v1855_v15 = vrot.slane %v3021_v33, 2 }
 0x1ef   : > { %v762_v45 = vadd.f32 %v761_v19, %v3997_v54 }
 0x1f0   : > { %v1149_v55 = vadd.f32 %v1107_v21, %v995_v24  ;;  %v1387_v20 = vpop.f32.mrf.mxu0  ;;  %v1967_v60 = vpop.f32.mrf.mxu3  ;;  %v1856_v21 = vrot.slane %v2955_v49, 3 }
 0x1f2   : > { %v3610_v31 = vadd.f32 %v1385_v38, %v1149_v55  ;;  %v2110_v38 = vsel %vm2093_vm7, %v2107_v4, %v2109_v50  ;;  %v1857_v52 = vor.u32 %v1856_v21, %v1855_v15  ;;  %v3998_v55 = vld [vmem:[#allocation33_spill] sm:$0xff] }
 0x1f5   : > { %v955_v43 = vpop.f32.mrf.mxu2 }
 0x1f6   : > { %v996_v63 = vadd.f32 %v955_v43, %v762_v45  ;;  %v764_v62 = vpop.f32.mrf.mxu1  ;;  %v2790_v43 = vld [vmem:[%s2857_s25 + $0x58] sm:$0xff] }
 0x1f7   : > { %v765_v35 = vadd.f32 %v764_v62, %v3998_v55 }
 0x1f8   : > { %v1150_v6 = vadd.f32 %v1109_v8, %v996_v63  ;;  %v1390_v24 = vpop.f32.mrf.mxu0  ;;  %v1969_v33 = vpop.f32.mrf.mxu3  ;;  %v1858_v8 = vsel %vm1815_vm5, %v1853_v18, %v1857_v52  ;;  %v3999_v63 = vld [vmem:[#allocation36_spill] sm:$0xff] }
 0x1f9   : > { %2673 = vmatmul.msk.bf16.gmra.mxu1 %vm473_vm2, %v1448_v23 }
 0x1fa   : > { %2691 = vmatmul.msk.bf16.gmra.mxu2 %vm473_vm2, %v1450_v5  ;;  %v3620_v19 = vadd.f32 %v1387_v20, %v1150_v6  ;;  %v1451_v20 = vrot.slane %v2790_v43, 2 }
 0x1fb   : > { %2727 = vmatmul.msk.bf16.gmra.mxu0 %vm473_vm2, %v2110_v38  ;;  %v2111_v38 = vrot.slane %v2790_v43, 3 }
 0x1fc   : > { %2711 = vmatmul.msk.bf16.gmra.mxu3 %vm473_vm2, %v1858_v8 }
 0x1fd   : > { %v958_v44 = vpop.f32.mrf.mxu2 }
 0x1fe   : > { %v997_v54 = vadd.f32 %v958_v44, %v765_v35  ;;  %v766_v49 = vpop.f32.mrf.mxu1  ;;  %v1452_v35 = vsel %vm1431_vm6, %v1449_v22, %v1451_v20  ;;  %v1859_v44 = vrot.slane %v3080_v0, 2 }
 0x1ff   : > { %v767_v6 = vadd.f32 %v766_v49, %v3999_v63 }
 0x200   : > { %v1151_v45 = vadd.f32 %v1112_v9, %v997_v54  ;;  %v1392_v4 = vpop.f32.mrf.mxu0  ;;  %v1972_v21 = vpop.f32.mrf.mxu3  ;;  %v1860_v9 = vrot.slane %v3024_v34, 3 }
 0x202   : > { %v3626_v23 = vadd.f32 %v1390_v24, %v1151_v45  ;;  %v2112_v24 = vsel %vm2093_vm7, %v2109_v50, %v2111_v38  ;;  %v1861_v8 = vor.u32 %v1860_v9, %v1859_v44  ;;  %v3644_v50 = vld [vmem:[%s3873_s2] ss:$0 sm:$0xff] }
 0x204   : > { %v1862_v43 = vsel %vm1815_vm5, %v1857_v52, %v1861_v8 }
 0x205   : > { %v960_v15 = vpop.f32.mrf.mxu2 }
 0x206   : > { %v998_v62 = vadd.f32 %v960_v15, %v767_v6  ;;  %v1535_v55 = vpop.f32.mrf.mxu1  ;;  %v2791_v6 = vld [vmem:[%s2857_s25 + $0x60] sm:$0xff] }
 0x207   : > { %v1625_v22 = vadd.f32 %v1535_v55, %v3311_v47  ;;  %v1453_v15 = vrot.slane %v2791_v6, 2  ;;  %v2113_v55 = vrot.slane %v2791_v6, 3 }
 0x208   : > { %v1152_v18 = vadd.f32 %v1114_v48, %v998_v62  ;;  %v2197_v54 = vpop.f32.mrf.mxu0  ;;  %v1974_v45 = vpop.f32.mrf.mxu3 }
 0x209   : > { %2674 = vmatmul.msk.bf16.gmra.mxu1 %vm473_vm2, %v1450_v5 }
 0x20a   : > { %2692 = vmatmul.msk.bf16.gmra.mxu2 %vm473_vm2, %v1452_v35  ;;  %v3636_v49 = vadd.f32 %v1392_v4, %v1152_v18 }
 0x20b   : > { %2728 = vmatmul.msk.bf16.gmra.mxu0 %vm473_vm2, %v2112_v24  ;;  %v1863_v24 = vrot.slane %v3119_v7, 2 }
 0x20c   : > { %2712 = vmatmul.msk.bf16.gmra.mxu3 %vm473_vm2, %v1862_v43 }
 0x20d   : > { %v1689_v0 = vpop.f32.mrf.mxu2 }
 0x20e   : > { %v1779_v34 = vadd.f32 %v1689_v0, %v1625_v22  ;;  %v1537_v48 = vpop.f32.mrf.mxu1  ;;  %v1864_v22 = vrot.slane %v3083_v56, 3 }
 0x20f   : > { %v1626_v62 = vadd.f32 %v1537_v48, %v3318_v37 }
 0x210   : > { %v2057_v63 = vadd.f32 %v1967_v60, %v1779_v34  ;;  %v2199_v5 = vpop.f32.mrf.mxu0  ;;  %v1977_v52 = vpop.f32.mrf.mxu3  ;;  %v2114_v34 = vsel %vm2093_vm7, %v2111_v38, %v2113_v55  ;;  %v1865_v43 = vor.u32 %v1864_v22, %v1863_v24 }
 0x212   : > { %v2287_v4 = vadd.f32 %v2197_v54, %v2057_v63  ;;  %v1454_v54 = vsel %vm1431_vm6, %v1451_v20, %v1453_v15  ;;  %v1866_v38 = vsel %vm1815_vm5, %v1861_v8, %v1865_v43 }
 0x214   : > { %v2326_v47 = vadd.f32 %v3644_v50, %v2287_v4 }
 0x215   : > { %v1691_v60 = vpop.f32.mrf.mxu2 }
 0x216   : > { %v2362_v44 = vmax.f32 %v2326_v47, 0.0  ;;  %v1780_v9 = vadd.f32 %v1691_v60, %v1626_v62  ;;  %v1540_v18 = vpop.f32.mrf.mxu1  ;;  %v2792_v62 = vld [vmem:[%s2857_s25 + $0x68] sm:$0xff] }
 0x217   : > { %v1627_v7 = vadd.f32 %v1540_v18, %v3330_v28  ;;  %v1455_v60 = vrot.slane %v2792_v62, 2 }
 0x218   : > { %2398 = vst [vmem:[%s3654_s16] sm:$0xff] %v2362_v44  ;;  %v2058_v37 = vadd.f32 %v1969_v33, %v1780_v9  ;;  %v2202_v0 = vpop.f32.mrf.mxu0  ;;  %v1979_v63 = vpop.f32.mrf.mxu3  ;;  %v2115_v9 = vrot.slane %v2792_v62, 3 }
 0x219   : > { %2675 = vmatmul.msk.bf16.gmra.mxu1 %vm473_vm2, %v1452_v35  ;;  %v1456_v8 = vsel %vm1431_vm6, %v1453_v15, %v1455_v60 }
 0x21a   : > { %v2288_v48 = vadd.f32 %v2199_v5, %v2058_v37  ;;  %2693 = vmatmul.msk.bf16.gmra.mxu2 %vm473_vm2, %v1454_v54 }
 0x21b   : > { %2729 = vmatmul.msk.bf16.gmra.mxu0 %vm473_vm2, %v2114_v34 }
 0x21c   : > { %v2327_v20 = vadd.f32 %v3644_v50, %v2288_v48  ;;  %2713 = vmatmul.msk.bf16.gmra.mxu3 %vm473_vm2, %v1866_v38 }
 0x21d   : > { %v1694_v56 = vpop.f32.mrf.mxu2 }
 0x21e   : > { %v2363_v33 = vmax.f32 %v2327_v20, 0.0  ;;  %v1781_v4 = vadd.f32 %v1694_v56, %v1627_v7  ;;  %v1542_v6 = vpop.f32.mrf.mxu1  ;;  %v2116_v7 = vsel %vm2093_vm7, %v2113_v55, %v2115_v9 }
 0x21f   : > { %v1628_v28 = vadd.f32 %v1542_v6, %v3338_v12 }
 0x220   : > { %2399 = vst [vmem:[%s3654_s16 + $0x8] sm:$0xff] %v2363_v33  ;;  %v2059_v5 = vadd.f32 %v1972_v21, %v1781_v4  ;;  %v2204_v35 = vpop.f32.mrf.mxu0  ;;  %v1982_v24 = vpop.f32.mrf.mxu3  ;;  %v1867_v21 = vrot.slane %v2932_v40, 2 }
 0x222   : > { %v2289_v47 = vadd.f32 %v2202_v0, %v2059_v5  ;;  %v1868_v0 = vrot.slane %v2929_v39, 3 }
 0x224   : > { %v2328_v44 = vadd.f32 %v3644_v50, %v2289_v47  ;;  %v1869_v12 = vor.u32 %v1868_v0, %v1867_v21  ;;  %v1872_v21 = vrot.slane %v2935_v41, 3 }
 0x225   : > { %v1696_v18 = vpop.f32.mrf.mxu2 }
 0x226   : > { %v2364_v22 = vmax.f32 %v2328_v44, 0.0  ;;  %v1782_v37 = vadd.f32 %v1696_v18, %v1628_v28  ;;  %v1545_v34 = vpop.f32.mrf.mxu1  ;;  %v1870_v55 = vsel %vm1815_vm5, %v1865_v43, %v1869_v12 }
 0x227   : > { %v1629_v40 = vadd.f32 %v1545_v34, %v3350_v3 }
 0x228   : > { %2400 = vst [vmem:[%s3654_s16 + $0x10] sm:$0xff] %v2364_v22  ;;  %v2060_v48 = vadd.f32 %v1974_v45, %v1782_v37  ;;  %v2207_v20 = vpop.f32.mrf.mxu0  ;;  %v1984_v33 = vpop.f32.mrf.mxu3 }
 0x229   : > { %2676 = vmatmul.msk.bf16.gmra.mxu1 %vm473_vm2, %v1454_v54 }
 0x22a   : > { %v2290_v56 = vadd.f32 %v2204_v35, %v2060_v48  ;;  %2694 = vmatmul.msk.bf16.gmra.mxu2 %vm473_vm2, %v1456_v8  ;;  %v2793_v35 = vld [vmem:[%s2857_s25 + $0x70] sm:$0xff] }
 0x22b   : > { %2730 = vmatmul.msk.bf16.gmra.mxu0 %vm473_vm2, %v2116_v7  ;;  %v1457_v47 = vrot.slane %v2793_v35, 2  ;;  %v2117_v44 = vrot.slane %v2793_v35, 3 }
 0x22c   : > { %v2329_v15 = vadd.f32 %v3644_v50, %v2290_v56  ;;  %2714 = vmatmul.msk.bf16.gmra.mxu3 %vm473_vm2, %v1870_v55 }
 0x22d   : > { %v1699_v39 = vpop.f32.mrf.mxu2  ;;  %v1458_v43 = vsel %vm1431_vm6, %v1455_v60, %v1457_v47 }
 0x22e   : > { %v2365_v45 = vmax.f32 %v2329_v15, 0.0  ;;  %v1783_v4 = vadd.f32 %v1699_v39, %v1629_v40  ;;  %v1547_v6 = vpop.f32.mrf.mxu1 }
 0x22f   : > { %v1630_v3 = vadd.f32 %v1547_v6, %v3358_v53 }
 0x230   : > { %2401 = vst [vmem:[%s3654_s16 + $0x18] sm:$0xff] %v2365_v45  ;;  %v2061_v38 = vadd.f32 %v1977_v52, %v1783_v4  ;;  %v2209_v54 = vpop.f32.mrf.mxu0  ;;  %v1987_v18 = vpop.f32.mrf.mxu3  ;;  %v1871_v52 = vrot.slane %v2983_v1, 2  ;;  %v2794_v4 = vld [vmem:[%s2857_s25 + $0x78] sm:$0xff] }
 0x231   : > { %v1459_v6 = vrot.slane %v2794_v4, 2 }
 0x232   : > { %v2291_v5 = vadd.f32 %v2207_v20, %v2061_v38  ;;  %v2118_v20 = vsel %vm2093_vm7, %v2115_v9, %v2117_v44  ;;  %v1873_v53 = vor.u32 %v1872_v21, %v1871_v52  ;;  %v2119_v38 = vrot.slane %v2794_v4, 3 }
 0x233   : > { %v4001_v4 = vshll.u32 %v3950_v51, 16 }
 0x234   : > { %v2330_v62 = vadd.f32 %v3644_v50, %v2291_v5  ;;  %v1874_v9 = vsel %vm1815_vm5, %v1869_v12, %v1873_v53  ;;  %v1460_v12 = vsel %vm1431_vm6, %v1457_v47, %v1459_v6 }
 0x235   : > { %v1701_v28 = vpop.f32.mrf.mxu2 }
 0x236   : > { %v2366_v22 = vmax.f32 %v2330_v62, 0.0  ;;  %v1784_v37 = vadd.f32 %v1701_v28, %v1630_v3  ;;  %v1550_v34 = vpop.f32.mrf.mxu1  ;;  %v1876_v28 = vrot.slane %v3952_v2, 3 }
 0x237   : > { %v1631_v1 = vadd.f32 %v1550_v34, %v3370_v10  ;;  %v2120_v34 = vsel %vm2093_vm7, %v2117_v44, %v2119_v38 }
 0x238   : > { %2402 = vst [vmem:[%s3654_s16 + $0x20] sm:$0xff] %v2366_v22  ;;  %v2062_v0 = vadd.f32 %v1979_v63, %v1784_v37  ;;  %v2212_v48 = vpop.f32.mrf.mxu0  ;;  %v1989_v56 = vpop.f32.mrf.mxu3 }
 0x239   : > { %2677 = vmatmul.msk.bf16.gmra.mxu1 %vm473_vm2, %v1456_v8 }
 0x23a   : > { %v2292_v7 = vadd.f32 %v2209_v54, %v2062_v0  ;;  %2695 = vmatmul.msk.bf16.gmra.mxu2 %vm473_vm2, %v1458_v43 }
 0x23b   : > { %2731 = vmatmul.msk.bf16.gmra.mxu0 %vm473_vm2, %v2118_v20 }
 0x23c   : > { %v2331_v60 = vadd.f32 %v3644_v50, %v2292_v7  ;;  %2715 = vmatmul.msk.bf16.gmra.mxu3 %vm473_vm2, %v1874_v9 }
 0x23d   : > { %v1704_v41 = vpop.f32.mrf.mxu2 }
 0x23e   : > { %v2367_v63 = vmax.f32 %v2331_v60, 0.0  ;;  %v1785_v15 = vadd.f32 %v1704_v41, %v1631_v1  ;;  %v1552_v40 = vpop.f32.mrf.mxu1  ;;  %v2795_v60 = vld [vmem:[%s2857_s25 + $0x80] sm:$0xff] }
 0x23f   : > { %v1632_v10 = vadd.f32 %v1552_v40, %v3378_v17  ;;  %v1461_v1 = vrot.slane %v2795_v60, 2 }
 0x240   : > { %2403 = vst [vmem:[%s3654_s16 + $0x28] sm:$0xff] %v2367_v63  ;;  %v2063_v39 = vadd.f32 %v1982_v24, %v1785_v15  ;;  %v2214_v8 = vpop.f32.mrf.mxu0  ;;  %v1992_v5 = vpop.f32.mrf.mxu3  ;;  %v1875_v24 = vrot.slane %v3951_v25, 2  ;;  %v2121_v63 = vrot.slane %v2795_v60, 3 }
 0x242   : > { %v2293_v45 = vadd.f32 %v2212_v48, %v2063_v39  ;;  %v1877_v17 = vor.u32 %v1876_v28, %v1875_v24 }
 0x244   : > { %v2332_v55 = vadd.f32 %v3644_v50, %v2293_v45  ;;  %v1878_v44 = vsel %vm1815_vm5, %v1873_v53, %v1877_v17 }
 0x245   : > { %v1706_v54 = vpop.f32.mrf.mxu2 }
 0x246   : > { %v2368_v35 = vmax.f32 %v2332_v55, 0.0  ;;  %v1786_v62 = vadd.f32 %v1706_v54, %v1632_v10  ;;  %v1555_v3 = vpop.f32.mrf.mxu1  ;;  %v1880_v55 = vrot.slane %v4001_v4, 3 }
 0x247   : > { %v1633_v25 = vadd.f32 %v1555_v3, %v3390_v11 }
 0x248   : > { %2404 = vst [vmem:[%s3654_s16 + $0x30] sm:$0xff] %v2368_v35  ;;  %v2064_v22 = vadd.f32 %v1984_v33, %v1786_v62  ;;  %v2217_v37 = vpop.f32.mrf.mxu0  ;;  %v1994_v21 = vpop.f32.mrf.mxu3 }
 0x249   : > { %2678 = vmatmul.msk.bf16.gmra.mxu1 %vm473_vm2, %v1458_v43 }
 0x24a   : > { %v2294_v52 = vadd.f32 %v2214_v8, %v2064_v22  ;;  %2696 = vmatmul.msk.bf16.gmra.mxu2 %vm473_vm2, %v1460_v12  ;;  %v4000_v8 = vshrl.u32 %v3950_v51, 16 }
 0x24b   : > { %2732 = vmatmul.msk.bf16.gmra.mxu0 %vm473_vm2, %v2120_v34 }
 0x24c   : > { %v2333_v47 = vadd.f32 %v3644_v50, %v2294_v52  ;;  %2716 = vmatmul.msk.bf16.gmra.mxu3 %vm473_vm2, %v1878_v44  ;;  %v1879_v45 = vrot.slane %v4000_v8, 2  ;;  %v2796_v52 = vld [vmem:[%s2857_s25 + $0x88] sm:$0xff] }
 0x24d   : > { %v1709_v2 = vpop.f32.mrf.mxu2 }
 0x24e   : > { %v2369_v33 = vmax.f32 %v2333_v47, 0.0  ;;  %v1787_v0 = vadd.f32 %v1709_v2, %v1633_v25  ;;  %v1557_v48 = vpop.f32.mrf.mxu1  ;;  %v1463_v47 = vrot.slane %v2796_v52, 2  ;;  %v3741_v25 = vld [vmem:[%s2857_s25 + $0x98] sm:$0xff]  }
 0x24f   : > { %v1634_v11 = vadd.f32 %v1557_v48, %v3398_v46  ;;  %v2122_v46 = vsel %vm2093_vm7, %v2119_v38, %v2121_v63  ;;  %v1887_v2 = vshll.u32 %v3741_v25, 16 }
 0x250   : > { %2405 = vst [vmem:[%s3654_s16 + $0x38] sm:$0xff] %v2369_v33  ;;  %v2065_v20 = vadd.f32 %v1987_v18, %v1787_v0  ;;  %v2219_v43 = vpop.f32.mrf.mxu0  ;;  %v3720_v40 = vpop.f32.mrf.mxu3  ;;  %v1462_v18 = vsel %vm1431_vm6, %v1459_v6, %v1461_v1  ;;  %v1881_v6 = vor.u32 %v1880_v55, %v1879_v45  ;;  %v2123_v0 = vrot.slane %v2796_v52, 3 }
 0x252   : > { %v2295_v7 = vadd.f32 %v2217_v37, %v2065_v20  ;;  %v1882_v22 = vsel %vm1815_vm5, %v1877_v17, %v1881_v6 }
 0x254   : > { %v2334_v41 = vadd.f32 %v3644_v50, %v2295_v7  ;;  %v1464_v7 = vsel %vm1431_vm6, %v1461_v1, %v1463_v47 }
 0x255   : > { %v1711_v15 = vpop.f32.mrf.mxu2 }
 0x256   : > { %v2370_v9 = vmax.f32 %v2334_v41, 0.0  ;;  %v1788_v39 = vadd.f32 %v1711_v15, %v1634_v11  ;;  %v1560_v53 = vpop.f32.mrf.mxu1  ;;  %v1889_v41 = vrot.slane %v1887_v2, 3 }
 0x257   : > { %v1635_v51 = vadd.f32 %v1560_v53, %v3413_v16  ;;  %v1884_v16 = vshrl.u32 %v3741_v25, 16 }
 0x258   : > { %2406 = vst [vmem:[%s3654_s16 + $0x40] sm:$0xff] %v2370_v9  ;;  %v2066_v10 = vadd.f32 %v1989_v56, %v1788_v39  ;;  %v2222_v54 = vpop.f32.mrf.mxu0  ;;  %v3734_v56 = vpop.f32.mrf.mxu3  ;;  %v2124_v9 = vsel %vm2093_vm7, %v2121_v63, %v2123_v0  ;;  %v230_v39 = vld [vmem:[%s2857_s25 + $0xa0] sm:$0x7] }
 0x259   : > { %2679 = vmatmul.msk.bf16.gmra.mxu1 %vm473_vm2, %v1460_v12  ;;  %v1886_v60 = vrot.slane %v1884_v16, 2  ;;  %v1664_v8 = vunpack.c.l.b16 %v230_v39  ;;  %v1667_v39 = vrot.slane %v3741_v25, 2 }
 0x25a   : > { %v2296_v35 = vadd.f32 %v2219_v43, %v2066_v10  ;;  %2697 = vmatmul.msk.bf16.gmra.mxu2 %vm473_vm2, %v1462_v18 }
 0x25b   : > { %2733 = vmatmul.msk.bf16.gmra.mxu0 %vm473_vm2, %v2122_v46  ;;  %v3759_v46 = vpack.c.b16 %v1664_v8, %v1664_v8  ;;  %v2127_v8 = vrot.slane %v3741_v25, 3 }
 0x25c   : > { %v2335_v62 = vadd.f32 %v3644_v50, %v2296_v35  ;;  %2717 = vmatmul.msk.bf16.gmra.mxu3 %vm473_vm2, %v1882_v22 }
 0x25d   : > { %v1714_v3 = vpop.f32.mrf.mxu2 }
 0x25e   : > { %v2371_v24 = vmax.f32 %v2335_v62, 0.0  ;;  %v1789_v28 = vadd.f32 %v1714_v3, %v1635_v51  ;;  %v1562_v38 = vpop.f32.mrf.mxu1  ;;  %v2798_v51 = vld [vmem:[%s2857_s25 + $0x90] sm:$0xff]  }
 0x25f   : > { %v1636_v17 = vadd.f32 %v1562_v38, %v3421_v58  ;;  %v1890_v58 = vor.u32 %v1889_v41, %v1886_v60  ;;  %v3765_v3 = vrot.slane %v2798_v51, 2  ;;  %v2125_v38 = vrot.slane %v2798_v51, 3 }
 0x260   : > { %2407 = vst [vmem:[%s3654_s16 + $0x48] sm:$0xff] %v2371_v24  ;;  %v2067_v12 = vadd.f32 %v1992_v5, %v1789_v28  ;;  %v2224_v37 = vpop.f32.mrf.mxu0  ;;  %v3747_v48 = vpop.f32.mrf.mxu3  ;;  %v1896_v24 = vshll.u32 %v3759_v46, 16 }
 0x261   : > { %v1466_v52 = vsel %vm1431_vm6, %v1463_v47, %v3765_v3 }
 0x262   : > { %v2297_v34 = vadd.f32 %v2222_v54, %v2067_v12  ;;  %v1891_v54 = vsel %vm1815_vm5, %v1881_v6, %v1890_v58  ;;  %v1898_v2 = vrot.slane %v1896_v24, 3 }
 0x264   : > { %v2336_v33 = vadd.f32 %v3644_v50, %v2297_v34 }
 0x265   : > { %v1716_v5 = vpop.f32.mrf.mxu2 }
 0x266   : > { %v2372_v44 = vmax.f32 %v2336_v33, 0.0  ;;  %v1790_v20 = vadd.f32 %v1716_v5, %v1636_v17  ;;  %v1565_v43 = vpop.f32.mrf.mxu1  ;;  %v2126_v5 = vsel %vm2093_vm7, %v2123_v0, %v2125_v38 }
 0x267   : > { %v1637_v45 = vadd.f32 %v1565_v43, %v3432_v42  ;;  %v1893_v42 = vshrl.u32 %v3759_v46, 16 }
 0x268   : > { %2408 = vst [vmem:[%s3654_s16 + $0x50] sm:$0xff] %v2372_v44  ;;  %v2068_v11 = vadd.f32 %v1994_v21, %v1790_v20  ;;  %v2227_v15 = vpop.f32.mrf.mxu0  ;;  %v2004_v4 = vpop.f32.mrf.mxu3 }
 0x269   : > { %2680 = vmatmul.msk.bf16.gmra.mxu1 %vm473_vm2, %v1462_v18  ;;  %v1895_v16 = vrot.slane %v1893_v42, 2 }
 0x26a   : > { %v2298_v53 = vadd.f32 %v2224_v37, %v2068_v11  ;;  %2698 = vmatmul.msk.bf16.gmra.mxu2 %vm473_vm2, %v1464_v7 }
 0x26b   : > { %2734 = vmatmul.msk.bf16.gmra.mxu0 %vm473_vm2, %v2124_v9 }
 0x26c   : > { %v2337_v1 = vadd.f32 %v3644_v50, %v2298_v53  ;;  %2718 = vmatmul.msk.bf16.gmra.mxu3 %vm473_vm2, %v1891_v54  ;;  %v2128_v54 = vsel %vm2093_vm7, %v2125_v38, %v2127_v8  ;;  %v1467_v38 = vrot.slane %v3435_v13, 2 }
 0x26d   : > { %v1719_v21 = vpop.f32.mrf.mxu2 }
 0x26e   : > { %v2373_v55 = vmax.f32 %v2337_v1, 0.0  ;;  %v1791_v63 = vadd.f32 %v1719_v21, %v1637_v45  ;;  %v1567_v10 = vpop.f32.mrf.mxu1 }
 0x26f   : > { %v1638_v6 = vadd.f32 %v1567_v10, %v3442_v57  ;;  %v1899_v57 = vor.u32 %v1898_v2, %v1895_v16 }
 0x270   : > { %2409 = vst [vmem:[%s3654_s16 + $0x58] sm:$0xff] %v2373_v55  ;;  %v2069_v18 = vadd.f32 %v3720_v40, %v1791_v63  ;;  %v2229_v35 = vpop.f32.mrf.mxu0  ;;  %v2007_v12 = vpop.f32.mrf.mxu3 }
 0x272   : > { %v2299_v62 = vadd.f32 %v2227_v15, %v2069_v18  ;;  %v1900_v15 = vsel %vm1815_vm5, %v1890_v58, %v1899_v57 }
 0x274   : > { %v2338_v28 = vadd.f32 %v3644_v50, %v2299_v62 }
 0x275   : > { %v1721_v22 = vpop.f32.mrf.mxu2 }
 0x276   : > { %v2374_v40 = vmax.f32 %v2338_v28, 0.0  ;;  %v1792_v37 = vadd.f32 %v1721_v22, %v1638_v6  ;;  %v1570_v34 = vpop.f32.mrf.mxu1  ;;  %v1669_v22 = vrot.slane %v3759_v46, 2 }
 0x277   : > { %v1639_v47 = vadd.f32 %v1570_v34, %v3455_v27 }
 0x278   : > { %2410 = vst [vmem:[%s3654_s16 + $0x60] sm:$0xff] %v2374_v40  ;;  %v2070_v33 = vadd.f32 %v3734_v56, %v1792_v37  ;;  %v2232_v17 = vpop.f32.mrf.mxu0  ;;  %v2009_v60 = vpop.f32.mrf.mxu3 }
 0x279   : > { %2681 = vmatmul.msk.bf16.gmra.mxu1 %vm473_vm2, %v1464_v7 }
 0x27a   : > { %v2300_v44 = vadd.f32 %v2229_v35, %v2070_v33  ;;  %2699 = vmatmul.msk.bf16.gmra.mxu2 %vm473_vm2, %v1466_v52 }
 0x27b   : > { %2735 = vmatmul.msk.bf16.gmra.mxu0 %vm473_vm2, %v2126_v5 }
 0x27c   : > { %v2339_v20 = vadd.f32 %v3644_v50, %v2300_v44  ;;  %2719 = vmatmul.msk.bf16.gmra.mxu3 %vm473_vm2, %v1900_v15 }
 0x27d   : > { %v1724_v43 = vpop.f32.mrf.mxu2 }
 0x27e   : > { %v2375_v41 = vmax.f32 %v2339_v20, 0.0  ;;  %v1793_v56 = vadd.f32 %v1724_v43, %v1639_v47  ;;  %v1572_v11 = vpop.f32.mrf.mxu1 }
 0x27f   : > { %v1640_v27 = vadd.f32 %v1572_v11, %v3467_v36 }
 0x280   : > { %2411 = vst [vmem:[%s3654_s16 + $0x68] sm:$0xff] %v2375_v41  ;;  %v2071_v0 = vadd.f32 %v3747_v48, %v1793_v56  ;;  %v2234_v7 = vpop.f32.mrf.mxu0  ;;  %v2012_v45 = vpop.f32.mrf.mxu3  ;;  %v1668_v48 = vsel %vm1431_vm6, %v3765_v3, %v1667_v39 }
 0x282   : > { %v2301_v9 = vadd.f32 %v2232_v17, %v2071_v0  ;;  %v1670_v17 = vsel %vm1431_vm6, %v1667_v39, %v1669_v22  ;;  %v4002_v0 = vld [vmem:[#allocation13_spill] sm:$0xff] }
 0x284   : > { %v2340_v53 = vadd.f32 %v3644_v50, %v2301_v9 }
 0x285   : > { %v1726_v1 = vpop.f32.mrf.mxu2 }
 0x286   : > { %v2376_v21 = vmax.f32 %v2340_v53, 0.0  ;;  %v1794_v58 = vadd.f32 %v1726_v1, %v1640_v27  ;;  %v1575_v55 = vpop.f32.mrf.mxu1 }
 0x287   : > { %v1641_v25 = vadd.f32 %v1575_v55, %v3475_v61  ;;  %v2129_v61 = vrot.slane %v3759_v46, 3  ;;  %v4003_v55 = vld [vmem:[#allocation20_spill] sm:$0xff] }
 0x288   : > { %2412 = vst [vmem:[%s3654_s16 + $0x70] sm:$0xff] %v2376_v21  ;;  %v2072_v63 = vadd.f32 %v2004_v4, %v1794_v58  ;;  %v2237_v10 = vpop.f32.mrf.mxu0  ;;  %v2014_v62 = vpop.f32.mrf.mxu3 }
 0x289   : > { %2682 = vmatmul.msk.bf16.gmra.mxu1 %vm473_vm2, %v1466_v52  ;;  %v2130_v44 = vsel %vm2093_vm7, %v2127_v8, %v2129_v61 }
 0x28a   : > { %v2302_v18 = vadd.f32 %v2234_v7, %v2072_v63  ;;  %2700 = vmatmul.msk.bf16.gmra.mxu2 %vm473_vm2, %v1668_v48 }
 0x28b   : > { %2736 = vmatmul.msk.bf16.gmra.mxu0 %vm473_vm2, %v2128_v54 }
 0x28c   : > { %v2341_v36 = vadd.f32 %v3644_v50, %v2302_v18 }
 0x28d   : > { %v1729_v35 = vpop.f32.mrf.mxu2 }
 0x28e   : > { %v2377_v51 = vmax.f32 %v2341_v36, 0.0  ;;  %v1795_v42 = vadd.f32 %v1729_v35, %v1641_v25  ;;  %v1577_v24 = vpop.f32.mrf.mxu1 }
 0x28f   : > { %v1642_v37 = vadd.f32 %v1577_v24, %v3487_v32 }
 0x290   : > { %2413 = vst [vmem:[%s3654_s16 + $0x78] sm:$0xff] %v2377_v51  ;;  %v2073_v4 = vadd.f32 %v2007_v12, %v1795_v42  ;;  %v2239_v28 = vpop.f32.mrf.mxu0  ;;  %v2017_v52 = vpop.f32.mrf.mxu3  ;;  %v1468_v12 = vsel %vm1431_vm6, %v3765_v3, %v1467_v38  ;;  %v4004_v42 = vld [vmem:[#allocation9_spill] sm:$0xff] }
 0x292   : > { %v2303_v6 = vadd.f32 %v2237_v10, %v2073_v4 }
 0x294   : > { %v2342_v40 = vadd.f32 %v3644_v50, %v2303_v6 }
 0x295   : > { %v1731_v34 = vpop.f32.mrf.mxu2 }
 0x296   : > { %v2378_v16 = vmax.f32 %v2342_v40, 0.0  ;;  %v1796_v2 = vadd.f32 %v1731_v34, %v1642_v37  ;;  %v1580_v33 = vpop.f32.mrf.mxu1  ;;  %v4005_v34 = vld [vmem:[#allocation17_spill] sm:$0xff] }
 0x297   : > { %v1643_v46 = vadd.f32 %v1580_v33, %v3493_v59 }
 0x298   : > { %2414 = vst [vmem:[%s3654_s16 + $0x80] sm:$0xff] %v2378_v16  ;;  %v2074_v13 = vadd.f32 %v2009_v60, %v1796_v2  ;;  %v2242_v5 = vpop.f32.mrf.mxu0  ;;  %v2019_v20 = vpop.f32.mrf.mxu3 }
 0x299   : > { %2683 = vmatmul.msk.bf16.gmra.mxu1 %vm473_vm2, %v1468_v12 }
 0x29a   : > { %v2304_v57 = vadd.f32 %v2239_v28, %v2074_v13  ;;  %2701 = vmatmul.msk.bf16.gmra.mxu2 %vm473_vm2, %v1670_v17 }
 0x29b   : > { %2737 = vmatmul.msk.bf16.gmra.mxu0 %vm473_vm2, %v2130_v44 }
 0x29c   : > { %v2343_v32 = vadd.f32 %v3644_v50, %v2304_v57 }
 0x29d   : > { %v1734_v3 = vpop.f32.mrf.mxu2 }
 0x29e   : > { %v2379_v47 = vmax.f32 %v2343_v32, 0.0  ;;  %v1797_v43 = vadd.f32 %v1734_v3, %v1643_v46  ;;  %v1582_v60 = vpop.f32.mrf.mxu1  ;;  %v4006_v32 = vld [vmem:[#allocation34_spill] sm:$0xff] }
 0x29f   : > { %v1644_v7 = vadd.f32 %v1582_v60, %v4002_v0 }
 0x2a0   : > { %2415 = vst [vmem:[%s3654_s16 + $0x88] sm:$0xff] %v2379_v47  ;;  %v2075_v41 = vadd.f32 %v2012_v45, %v1797_v43  ;;  %v2244_v56 = vpop.f32.mrf.mxu0  ;;  %v2022_v39 = vpop.f32.mrf.mxu3 }
 0x2a2   : > { %v2305_v11 = vadd.f32 %v2242_v5, %v2075_v41 }
 0x2a4   : > { %v2344_v15 = vadd.f32 %v3644_v50, %v2305_v11 }
 0x2a5   : > { %v1736_v9 = vpop.f32.mrf.mxu2 }
 0x2a6   : > { %v2380_v53 = vmax.f32 %v2344_v15, 0.0  ;;  %v1798_v27 = vadd.f32 %v1736_v9, %v1644_v7  ;;  %v1585_v59 = vpop.f32.mrf.mxu1  ;;  %v4007_v15 = vld [vmem:[#allocation19_spill] sm:$0xff] }
 0x2a7   : > { %v1645_v45 = vadd.f32 %v1585_v59, %v4003_v55 }
 0x2a8   : > { %2416 = vst [vmem:[%s3654_s16 + $0x90] sm:$0xff] %v2380_v53  ;;  %v2076_v8 = vadd.f32 %v2014_v62, %v1798_v27  ;;  %v2247_v1 = vpop.f32.mrf.mxu0  ;;  %v2024_v18 = vpop.f32.mrf.mxu3 }
 0x2aa   : > { %v2306_v21 = vadd.f32 %v2244_v56, %v2076_v8 }
 0x2ac   : > { %v2345_v58 = vadd.f32 %v3644_v50, %v2306_v21 }
 0x2ad   : > { %v1739_v48 = vpop.f32.mrf.mxu2 }
 0x2ae   : > { %v2381_v63 = vmax.f32 %v2345_v58, 0.0  ;;  %v1799_v10 = vadd.f32 %v1739_v48, %v1645_v45  ;;  %v1587_v54 = vpop.f32.mrf.mxu1  ;;  %v4008_v58 = vld [vmem:[#allocation37_spill] sm:$0xff] }
 0x2af   : > { %v1646_v62 = vadd.f32 %v1587_v54, %v4004_v42 }
 0x2b0   : > { %2417 = vst [vmem:[%s3654_s16 + $0x98] sm:$0xff] %v2381_v63  ;;  %v2077_v36 = vadd.f32 %v2017_v52, %v1799_v10  ;;  %v2249_v25 = vpop.f32.mrf.mxu0  ;;  %v2027_v40 = vpop.f32.mrf.mxu3 }
 0x2b2   : > { %v2307_v35 = vadd.f32 %v2247_v1, %v2077_v36 }
 0x2b4   : > { %v2346_v51 = vadd.f32 %v3644_v50, %v2307_v35 }
 0x2b5   : > { %v1741_v24 = vpop.f32.mrf.mxu2 }
 0x2b6   : > { %v2382_v4 = vmax.f32 %v2346_v51, 0.0  ;;  %v1800_v28 = vadd.f32 %v1741_v24, %v1646_v62  ;;  %v1590_v6 = vpop.f32.mrf.mxu1  ;;  %v4009_v51 = vld [vmem:[#allocation21_spill] sm:$0xff] }
 0x2b7   : > { %v1647_v52 = vadd.f32 %v1590_v6, %v4005_v34 }
 0x2b8   : > { %2418 = vst [vmem:[%s3654_s16 + $0xa0] sm:$0xff] %v2382_v4  ;;  %v2078_v38 = vadd.f32 %v2019_v20, %v1800_v28  ;;  %v2252_v22 = vpop.f32.mrf.mxu0  ;;  %v2029_v44 = vpop.f32.mrf.mxu3 }
 0x2ba   : > { %v2308_v37 = vadd.f32 %v2249_v25, %v2078_v38 }
 0x2bc   : > { %v2347_v61 = vadd.f32 %v3644_v50, %v2308_v37 }
 0x2bd   : > { %v1744_v16 = vpop.f32.mrf.mxu2 }
 0x2be   : > { %v2383_v2 = vmax.f32 %v2347_v61, 0.0  ;;  %v1801_v33 = vadd.f32 %v1744_v16, %v1647_v52  ;;  %v1592_v12 = vpop.f32.mrf.mxu1  ;;  %v4010_v61 = vld [vmem:[#allocation18_spill] sm:$0xff] }
 0x2bf   : > { %v1648_v46 = vadd.f32 %v1592_v12, %v4006_v32 }
 0x2c0   : > { %2419 = vst [vmem:[%s3654_s16 + $0xa8] sm:$0xff] %v2383_v2  ;;  %v2079_v17 = vadd.f32 %v2022_v39, %v1801_v33  ;;  %v2254_v13 = vpop.f32.mrf.mxu0  ;;  %v2032_v9 = vpop.f32.mrf.mxu3 }
 0x2c2   : > { %v2309_v5 = vadd.f32 %v2252_v22, %v2079_v17 }
 0x2c4   : > { %v2348_v57 = vadd.f32 %v3644_v50, %v2309_v5 }
 0x2c5   : > { %v1746_v3 = vpop.f32.mrf.mxu2 }
 0x2c6   : > { %v2384_v20 = vmax.f32 %v2348_v57, 0.0  ;;  %v1802_v47 = vadd.f32 %v1746_v3, %v1648_v46  ;;  %v1595_v43 = vpop.f32.mrf.mxu1 }
 0x2c7   : > { %v1649_v0 = vadd.f32 %v1595_v43, %v4007_v15 }
 0x2c8   : > { %2420 = vst [vmem:[%s3654_s16 + $0xb0] sm:$0xff] %v2384_v20  ;;  %v2080_v60 = vadd.f32 %v2024_v18, %v1802_v47  ;;  %v2257_v41 = vpop.f32.mrf.mxu0  ;;  %v2034_v54 = vpop.f32.mrf.mxu3 }
 0x2ca   : > { %v2310_v56 = vadd.f32 %v2254_v13, %v2080_v60 }
 0x2cc   : > { %v2349_v11 = vadd.f32 %v3644_v50, %v2310_v56 }
 0x2cd   : > { %v1749_v7 = vpop.f32.mrf.mxu2 }
 0x2ce   : > { %v2385_v39 = vmax.f32 %v2349_v11, 0.0  ;;  %v1803_v53 = vadd.f32 %v1749_v7, %v1649_v0  ;;  %v1597_v27 = vpop.f32.mrf.mxu1 }
 0x2cf   : > { %v1650_v55 = vadd.f32 %v1597_v27, %v4008_v58 }
 0x2d0   : > { %2421 = vst [vmem:[%s3654_s16 + $0xb8] sm:$0xff] %v2385_v39  ;;  %v2081_v59 = vadd.f32 %v2027_v40, %v1803_v53  ;;  %v2259_v8 = vpop.f32.mrf.mxu0  ;;  %v2037_v22 = vpop.f32.mrf.mxu3 }
 0x2d2   : > { %v2311_v1 = vadd.f32 %v2257_v41, %v2081_v59 }
 0x2d4   : > { %v2350_v21 = vadd.f32 %v3644_v50, %v2311_v1 }
 0x2d5   : > { %v1751_v45 = vpop.f32.mrf.mxu2 }
 0x2d6   : > { %v2386_v48 = vmax.f32 %v2350_v21, 0.0  ;;  %v1804_v63 = vadd.f32 %v1751_v45, %v1650_v55  ;;  %v1600_v10 = vpop.f32.mrf.mxu1 }
 0x2d7   : > { %v1651_v42 = vadd.f32 %v1600_v10, %v4009_v51 }
 0x2d8   : > { %2422 = vst [vmem:[%s3654_s16 + $0xc0] sm:$0xff] %v2386_v48  ;;  %v2082_v18 = vadd.f32 %v2029_v44, %v1804_v63  ;;  %v2262_v36 = vpop.f32.mrf.mxu0  ;;  %v2039_v5 = vpop.f32.mrf.mxu3 }
 0x2da   : > { %v2312_v25 = vadd.f32 %v2259_v8, %v2082_v18 }
 0x2dc   : > { %v2351_v35 = vadd.f32 %v3644_v50, %v2312_v25 }
 0x2dd   : > { %v1754_v62 = vpop.f32.mrf.mxu2 }
 0x2de   : > { %v2387_v24 = vmax.f32 %v2351_v35, 0.0  ;;  %v1805_v4 = vadd.f32 %v1754_v62, %v1651_v42  ;;  %v1602_v28 = vpop.f32.mrf.mxu1 }
 0x2df   : > { %v1652_v34 = vadd.f32 %v1602_v28, %v4010_v61 }
 0x2e0   : > { %2423 = vst [vmem:[%s3654_s16 + $0xc8] sm:$0xff] %v2387_v24  ;;  %v2083_v6 = vadd.f32 %v2032_v9, %v1805_v4  ;;  %v2264_v38 = vpop.f32.mrf.mxu0  ;;  %v2042_v15 = vpop.f32.mrf.mxu3 }
 0x2e2   : > { %v2313_v40 = vadd.f32 %v2262_v36, %v2083_v6 }
 0x2e4   : > { %v2352_v37 = vadd.f32 %v3644_v50, %v2313_v40 }
 0x2e5   : > { %v1756_v52 = vpop.f32.mrf.mxu2 }
 0x2e6   : > { %v2388_v16 = vmax.f32 %v2352_v37, 0.0  ;;  %v1806_v2 = vadd.f32 %v1756_v52, %v1652_v34  ;;  %v1605_v33 = vpop.f32.mrf.mxu1 }
 0x2e7   : > { %v1653_v57 = vadd.f32 %v1605_v33, %v3578_v29 }
 0x2e8   : > { %2424 = vst [vmem:[%s3654_s16 + $0xd0] sm:$0xff] %v2388_v16  ;;  %v2084_v12 = vadd.f32 %v2034_v54, %v1806_v2  ;;  %v2267_v17 = vpop.f32.mrf.mxu0 }
 0x2ea   : > { %v2314_v13 = vadd.f32 %v2264_v38, %v2084_v12 }
 0x2ec   : > { %v2353_v44 = vadd.f32 %v3644_v50, %v2314_v13 }
 0x2ed   : > { %v1759_v32 = vpop.f32.mrf.mxu2 }
 0x2ee   : > { %v2389_v46 = vmax.f32 %v2353_v44, 0.0  ;;  %v1807_v3 = vadd.f32 %v1759_v32, %v1653_v57  ;;  %v1607_v20 = vpop.f32.mrf.mxu1 }
 0x2ef   : > { %v1654_v56 = vadd.f32 %v1607_v20, %v3588_v26  ;;  %v2044_v26 = vpop.f32.mrf.mxu3 }
 0x2f0   : > { %2425 = vst [vmem:[%s3654_s16 + $0xd8] sm:$0xff] %v2389_v46  ;;  %v2085_v47 = vadd.f32 %v2037_v22, %v1807_v3  ;;  %v2269_v43 = vpop.f32.mrf.mxu0 }
 0x2f2   : > { %v2315_v60 = vadd.f32 %v2267_v17, %v2085_v47 }
 0x2f4   : > { %v2354_v41 = vadd.f32 %v3644_v50, %v2315_v60 }
 0x2f5   : > { %v1761_v11 = vpop.f32.mrf.mxu2 }
 0x2f6   : > { %v2390_v0 = vmax.f32 %v2354_v41, 0.0  ;;  %v1808_v7 = vadd.f32 %v1761_v11, %v1654_v56  ;;  %v1610_v9 = vpop.f32.mrf.mxu1 }
 0x2f7   : > { %v1655_v59 = vadd.f32 %v1610_v9, %v3594_v30  ;;  %v2047_v35 = vpop.f32.mrf.mxu3 }
 0x2f8   : > { %2426 = vst [vmem:[%s3654_s16 + $0xe0] sm:$0xff] %v2390_v0  ;;  %v2086_v29 = vadd.f32 %v2039_v5, %v1808_v7  ;;  %v2272_v39 = vpop.f32.mrf.mxu0 }
 0x2fa   : > { %v2316_v53 = vadd.f32 %v2269_v43, %v2086_v29 }
 0x2fc   : > { %v2355_v27 = vadd.f32 %v3644_v50, %v2316_v53 }
 0x2fd   : > { %v1764_v8 = vpop.f32.mrf.mxu2 }
 0x2fe   : > { %v2391_v1 = vmax.f32 %v2355_v27, 0.0  ;;  %v1809_v21 = vadd.f32 %v1764_v8, %v1655_v59  ;;  %v1612_v58 = vpop.f32.mrf.mxu1 }
 0x2ff   : > { %v1656_v10 = vadd.f32 %v1612_v58, %v3604_v14  ;;  %v2049_v40 = vpop.f32.mrf.mxu3 }
 0x300   : > { %2427 = vst [vmem:[%s3654_s16 + $0xe8] sm:$0xff] %v2391_v1  ;;  %v2087_v55 = vadd.f32 %v2042_v15, %v1809_v21  ;;  %v2274_v45 = vpop.f32.mrf.mxu0 }
 0x302   : > { %v2317_v48 = vadd.f32 %v2272_v39, %v2087_v55 }
 0x304   : > { %v2356_v63 = vadd.f32 %v3644_v50, %v2317_v48 }
 0x305   : > { %v1766_v54 = vpop.f32.mrf.mxu2 }
 0x306   : > { %v2392_v18 = vmax.f32 %v2356_v63, 0.0  ;;  %v1810_v36 = vadd.f32 %v1766_v54, %v1656_v10  ;;  %v1615_v25 = vpop.f32.mrf.mxu1 }
 0x307   : > { %v1657_v24 = vadd.f32 %v1615_v25, %v3610_v31  ;;  %v2052_v5 = vpop.f32.mrf.mxu3 }
 0x308   : > { %2428 = vst [vmem:[%s3654_s16 + $0xf0] sm:$0xff] %v2392_v18  ;;  %v2088_v30 = vadd.f32 %v2044_v26, %v1810_v36  ;;  %v2277_v42 = vpop.f32.mrf.mxu0 }
 0x30a   : > { %v2318_v51 = vadd.f32 %v2274_v45, %v2088_v30 }
 0x30c   : > { %v2357_v62 = vadd.f32 %v3644_v50, %v2318_v51 }
 0x30d   : > { %v1769_v4 = vpop.f32.mrf.mxu2 }
 0x30e   : > { %v2393_v28 = vmax.f32 %v2357_v62, 0.0  ;;  %v1811_v6 = vadd.f32 %v1769_v4, %v1657_v24  ;;  %v1617_v38 = vpop.f32.mrf.mxu1 }
 0x30f   : > { %v1658_v61 = vadd.f32 %v1617_v38, %v3620_v19  ;;  %v2054_v11 = vpop.f32.mrf.mxu3 }
 0x310   : > { %2429 = vst [vmem:[%s3654_s16 + $0xf8] sm:$0xff] %v2393_v28  ;;  %v2089_v14 = vadd.f32 %v2047_v35, %v1811_v6  ;;  %v2279_v34 = vpop.f32.mrf.mxu0 }
 0x312   : > { %v2319_v22 = vadd.f32 %v2277_v42, %v2089_v14 }
 0x314   : > { %v2358_v37 = vadd.f32 %v3644_v50, %v2319_v22 }
 0x315   : > { %v1771_v52 = vpop.f32.mrf.mxu2 }
 0x316   : > { %v2394_v16 = vmax.f32 %v2358_v37, 0.0  ;;  %v1812_v2 = vadd.f32 %v1771_v52, %v1658_v61  ;;  %v1620_v33 = vpop.f32.mrf.mxu1 }
 0x317   : > { %v1659_v13 = vadd.f32 %v1620_v33, %v3626_v23 }
 0x318   : > { %2430 = vst [vmem:[%s3654_s16 + $0x100] sm:$0xff] %v2394_v16  ;;  %v2090_v31 = vadd.f32 %v2049_v40, %v1812_v2  ;;  %v2282_v46 = vpop.f32.mrf.mxu0 }
 0x31a   : > { %v2320_v12 = vadd.f32 %v2279_v34, %v2090_v31 }
 0x31c   : > { %v2359_v17 = vadd.f32 %v3644_v50, %v2320_v12 }
 0x31d   : > { %v1774_v44 = vpop.f32.mrf.mxu2 }
 0x31e   : > { %v2395_v57 = vmax.f32 %v2359_v17, 0.0  ;;  %v1813_v32 = vadd.f32 %v1774_v44, %v1659_v13  ;;  %v1622_v3 = vpop.f32.mrf.mxu1 }
 0x31f   : > { %v1660_v43 = vadd.f32 %v1622_v3, %v3636_v49 }
 0x320   : > { %2431 = vst [vmem:[%s3654_s16 + $0x108] sm:$0xff] %v2395_v57  ;;  %v2091_v19 = vadd.f32 %v2052_v5, %v1813_v32  ;;  %v2284_v15 = vpop.f32.mrf.mxu0 }
 0x322   : > { %v2321_v20 = vadd.f32 %v2282_v46, %v2091_v19 }
 0x324   : > { %v2360_v47 = vadd.f32 %v3644_v50, %v2321_v20 }
 0x325   : > { %v1776_v60 = vpop.f32.mrf.mxu2 }
 0x326   : > { %v2396_v41 = vmax.f32 %v2360_v47, 0.0  ;;  %v1814_v56 = vadd.f32 %v1776_v60, %v1660_v43 }
 0x328   : > { %2432 = vst [vmem:[%s3654_s16 + $0x110] sm:$0xff] %v2396_v41  ;;  %v2092_v23 = vadd.f32 %v2054_v11, %v1814_v56 }
 0x32a   : > { %v2322_v0 = vadd.f32 %v2284_v15, %v2092_v23 }
 0x32c   : > { %v2361_v7 = vadd.f32 %v3644_v50, %v2322_v0 }
 0x32e   : > { %v2397_v9 = vmax.f32 %v2361_v7, 0.0 }
 0x330   : > { %2433 = vst [vmem:[%s3654_s16 + $0x118] sm:$0xff] %v2397_v9 }
 0x331 PF: > { %s13_s12 = sadd.s32 1, %s2805_s12  }
 0x332   : > { %p10_p4 = scmp.ge.s32.totalorder %s13_s12, 4  }
 0x334   :  { %12 = sbr.rel (!%p10_p4) target bundleno = 1 (0x1), region = 70 }

</bundles_post_ra>
